<compile_context>
chip_gen: v7x
topology: tpu7x:2x2x1
jax: 0.10.0
libtpu: 0.0.40
codegen_flags: <defaults>
</compile_context>

<pallas_src>
import jax
import jax.numpy as jnp
from jax import lax
from jax.experimental import pallas as pl
from jax.experimental.pallas import tpu as pltpu


LANE = 128
SUBLANE = 8


def _round_up(x, m):
    return ((x + m - 1) // m) * m


def _critic_kernel(obs_ref, wpre_ref, bpre_ref, wih_ref, whh_ref, bg_ref,
                   wfc_ref, bfc_ref, out_ref, gin_scr):
    T, B, Dp = obs_ref.shape
    Hp = whh_ref.shape[0]

    # ---- Phase 1: hoisted time-independent projections (big MXU matmuls) ----
    obs_flat = obs_ref[...].reshape(T * B, Dp)                     # (T*B, Dp)
    x = jnp.dot(obs_flat, wpre_ref[...], preferred_element_type=jnp.float32)
    x = jnp.maximum(x + bpre_ref[...], 0.0)                        # (T*B, Hp)
    gin = jnp.dot(x, wih_ref[...], preferred_element_type=jnp.float32)
    gin = gin + bg_ref[...]                                        # (T*B, 4Hp)
    gin_scr[...] = gin.reshape(T, B, 4 * Hp)                       # time-major

    # ---- Phase 2: LSTM recurrence, h/c carried in registers -----------------
    def step(t, carry):
        h, c = carry
        gates = gin_scr[t] + jnp.dot(h, whh_ref[...],
                                     preferred_element_type=jnp.float32)
        i_g = jax.nn.sigmoid(gates[:, 0 * Hp:1 * Hp])
        f_g = jax.nn.sigmoid(gates[:, 1 * Hp:2 * Hp])
        g_g = jnp.tanh(gates[:, 2 * Hp:3 * Hp])
        o_g = jax.nn.sigmoid(gates[:, 3 * Hp:4 * Hp])
        c_new = f_g * c + i_g * g_g
        h_new = o_g * jnp.tanh(c_new)
        return h_new, c_new

    h0 = jnp.zeros((B, Hp), jnp.float32)
    c0 = jnp.zeros((B, Hp), jnp.float32)
    h, _ = lax.fori_loop(0, T, step, (h0, c0), unroll=True)

    # ---- fc2 on the last hidden state: VPU mul + lane reduce, lane-dense out -
    val = jnp.sum(h * wfc_ref[...], axis=-1, keepdims=True)        # (B, 1)
    out_ref[...] = val + bfc_ref[...]                              # (B, LANE)


def recurrent_critic_forward(obs, params):
    """obs: (B, T, D) float32, returns (B, 1) float32."""
    B, T, D = obs.shape
    H = params["w_pre"].shape[1]
    Dp = _round_up(D, LANE)
    Hp = _round_up(H, LANE)

    Bp8 = _round_up(B, SUBLANE)
    B_TILE = Bp8 if Bp8 <= 128 else 128      # batch tile (parallel grid axis)
    Bp = _round_up(Bp8, B_TILE)

    # ---- host-side packing: zero padding keeps the math exact ---------------
    obs_p = jnp.pad(obs.astype(jnp.float32),
                    ((0, Bp - B), (0, 0), (0, Dp - D)))
    obs_tm = jnp.transpose(obs_p, (1, 0, 2))                       # (T, Bp, Dp)

    w_pre = jnp.pad(params["w_pre"], ((0, Dp - D), (0, Hp - H)))   # (Dp, Hp)
    b_pre = jnp.pad(params["b_pre"], ((0, 0), (0, Hp - H)))        # (1, Hp)

    def pad_gate_cols(w):  # (.., 4H) -> (.., 4*Hp), each gate block lane-padded
        blocks = [jnp.pad(w[:, g * H:(g + 1) * H], ((0, 0), (0, Hp - H)))
                  for g in range(4)]
        return jnp.concatenate(blocks, axis=1)

    w_ih = jnp.pad(pad_gate_cols(params["w_ih"]), ((0, Hp - H), (0, 0)))
    w_hh = jnp.pad(pad_gate_cols(params["w_hh"]), ((0, Hp - H), (0, 0)))
    b_g = pad_gate_cols(params["b_ih"] + params["b_hh"])           # (1, 4Hp)
    w_fc = jnp.pad(params["w_fc2"].T, ((0, 0), (0, Hp - H)))       # (1, Hp)
    b_fc = jnp.broadcast_to(params["b_fc2"].reshape(1, 1), (1, LANE))

    full = lambda shape: pl.BlockSpec(shape, lambda b: (0,) * len(shape))

    out_p = pl.pallas_call(
        _critic_kernel,
        out_shape=jax.ShapeDtypeStruct((Bp, LANE), jnp.float32),
        grid_spec=pltpu.PrefetchScalarGridSpec(
            num_scalar_prefetch=0,
            grid=(Bp // B_TILE,),
            in_specs=[
                pl.BlockSpec((T, B_TILE, Dp), lambda b: (0, b, 0)),  # obs tile
                full((Dp, Hp)),          # w_pre^T (padded)
                full((1, Hp)),           # b_pre
                full((Hp, 4 * Hp)),      # w_ih^T (gate-block lane-padded)
                full((Hp, 4 * Hp)),      # w_hh^T
                full((1, 4 * Hp)),       # b_ih + b_hh (pre-summed)
                full((1, Hp)),           # w_fc2 row
                full((1, LANE)),         # b_fc2 broadcast to a lane-dense row
            ],
            out_specs=pl.BlockSpec((B_TILE, LANE), lambda b: (b, 0)),
            scratch_shapes=[
                pltpu.VMEM((T, B_TILE, 4 * Hp), jnp.float32),  # gate inputs
            ],
        ),
        compiler_params=pltpu.CompilerParams(
            dimension_semantics=("parallel",),
            vmem_limit_bytes=32 * 1024 * 1024),
    )(obs_tm, w_pre, b_pre, w_ih, w_hh, b_g, w_fc, b_fc)

    return out_p[:B, :1]


def init_params(key, obs_dim, hidden):
    """Deterministic PyTorch-default-style init (uniform +-1/sqrt(fan_in))."""
    ks = jax.random.split(key, 9)
    u = lambda k, shape, fan: jax.random.uniform(
        k, shape, jnp.float32, -1.0 / jnp.sqrt(fan), 1.0 / jnp.sqrt(fan))
    return {
        # preprocess Linear(obs_dim -> hidden), stored transposed (D, H)
        "w_pre": u(ks[0], (obs_dim, hidden), obs_dim),
        "b_pre": u(ks[1], (1, hidden), obs_dim),
        # LSTM(hidden -> hidden), weights stored transposed (in, 4H)
        "w_ih": u(ks[2], (hidden, 4 * hidden), hidden),
        "w_hh": u(ks[3], (hidden, 4 * hidden), hidden),
        "b_ih": u(ks[4], (1, 4 * hidden), hidden),
        "b_hh": u(ks[5], (1, 4 * hidden), hidden),
        # fc2 Linear(hidden -> 1), stored transposed (H, 1)
        "w_fc2": u(ks[6], (hidden, 1), hidden),
        "b_fc2": u(ks[7], (1, 1), hidden),
    }


def ref_forward(obs, params):
    """Pure-JAX reference of the same forward pass."""
    B = obs.shape[0]
    H = params["w_pre"].shape[1]
    x = jnp.maximum(obs @ params["w_pre"] + params["b_pre"], 0.0)   # (B, T, H)
    h = jnp.zeros((B, H), jnp.float32)
    c = jnp.zeros((B, H), jnp.float32)
    for t in range(obs.shape[1]):
        gates = (x[:, t, :] @ params["w_ih"] + params["b_ih"]
                 + h @ params["w_hh"] + params["b_hh"])
        i_g = jax.nn.sigmoid(gates[:, 0 * H:1 * H])
        f_g = jax.nn.sigmoid(gates[:, 1 * H:2 * H])
        g_g = jnp.tanh(gates[:, 2 * H:3 * H])
        o_g = jax.nn.sigmoid(gates[:, 3 * H:4 * H])
        c = f_g * c + i_g * g_g
        h = o_g * jnp.tanh(c)
    return h @ params["w_fc2"] + params["b_fc2"]


if __name__ == "__main__":
    B, T, D, H = 2, 8, 8, 32   # batch, seq, obs feature dim, hidden_layer_size

    key = jax.random.PRNGKey(0)
    k_obs, k_par = jax.random.split(key)
    obs = jax.random.normal(k_obs, (B, T, D), jnp.float32)
    params = init_params(k_par, D, H)

    out = recurrent_critic_forward(obs, params)
    out = jax.block_until_ready(out)

    ref = ref_forward(obs, params)
    assert out.shape == (B, 1)
    assert jnp.allclose(out, ref, atol=1e-4, rtol=1e-4), (out, ref)

    print("KERNEL_OK")
</pallas_src>

<mosaic_0001>
module attributes {stable_mosaic.version = 11 : i64} {
  func.func @_critic_kernel(%arg0: i32, %arg1: memref<8x8x128xf32, #tpu.memory_space<vmem>>, %arg2: memref<128x128xf32, #tpu.memory_space<vmem>>, %arg3: memref<1x128xf32, #tpu.memory_space<vmem>>, %arg4: memref<128x512xf32, #tpu.memory_space<vmem>>, %arg5: memref<128x512xf32, #tpu.memory_space<vmem>>, %arg6: memref<1x512xf32, #tpu.memory_space<vmem>>, %arg7: memref<1x128xf32, #tpu.memory_space<vmem>>, %arg8: memref<1x128xf32, #tpu.memory_space<vmem>>, %arg9: memref<8x128xf32, #tpu.memory_space<vmem>>, %arg10: memref<8x8x512xf32, #tpu.memory_space<vmem>>) attributes {dimension_semantics = [#tpu.dimension_semantics<parallel>], iteration_bounds = array<i64: 1>, scalar_prefetch = 0 : i64, scratch_operands = 1 : i64, tpu.core_type = #tpu.core_type<tc>, window_params = [{transform_indices = @transform_0, window_bounds = array<i64: 8, 8, 128>}, {pipeline_mode = #tpu.pipeline_mode<synchronous>, transform_indices = @transform_1, window_bounds = array<i64: 128, 128>}, {pipeline_mode = #tpu.pipeline_mode<synchronous>, transform_indices = @transform_2, window_bounds = array<i64: 1, 128>}, {pipeline_mode = #tpu.pipeline_mode<synchronous>, transform_indices = @transform_3, window_bounds = array<i64: 128, 512>}, {pipeline_mode = #tpu.pipeline_mode<synchronous>, transform_indices = @transform_4, window_bounds = array<i64: 128, 512>}, {pipeline_mode = #tpu.pipeline_mode<synchronous>, transform_indices = @transform_5, window_bounds = array<i64: 1, 512>}, {pipeline_mode = #tpu.pipeline_mode<synchronous>, transform_indices = @transform_6, window_bounds = array<i64: 1, 128>}, {pipeline_mode = #tpu.pipeline_mode<synchronous>, transform_indices = @transform_7, window_bounds = array<i64: 1, 128>}, {transform_indices = @transform_8, window_bounds = array<i64: 8, 128>}]} {
    %c0 = arith.constant 0 : index
    %c0_0 = arith.constant 0 : index
    %c0_1 = arith.constant 0 : index
    %0 = vector.load %arg1[%c0, %c0_0, %c0_1] : memref<8x8x128xf32, #tpu.memory_space<vmem>>, vector<8x8x128xf32>
    %1 = vector.shape_cast %0 : vector<8x8x128xf32> to vector<64x128xf32>
    %c0_2 = arith.constant 0 : index
    %c0_3 = arith.constant 0 : index
    %2 = vector.load %arg2[%c0_2, %c0_3] : memref<128x128xf32, #tpu.memory_space<vmem>>, vector<128x128xf32>
    %cst = arith.constant dense<0.000000e+00> : vector<64x128xf32>
    %3 = tpu.matmul %1, %2, %cst {dimension_numbers = #tpu.dot_dimension_numbers<[1], [0], [0], [1], [0, 0, 1, 1], [], []>} : vector<64x128xf32>, vector<128x128xf32>, vector<64x128xf32> -> vector<64x128xf32>
    %c0_4 = arith.constant 0 : index
    %c0_5 = arith.constant 0 : index
    %4 = vector.load %arg3[%c0_4, %c0_5] : memref<1x128xf32, #tpu.memory_space<vmem>>, vector<1x128xf32>
    %5 = vector.broadcast %4 : vector<1x128xf32> to vector<64x128xf32>
    %6 = arith.addf %3, %5 : vector<64x128xf32>
    %cst_6 = arith.constant 0.000000e+00 : f32
    %7 = vector.broadcast %cst_6 : f32 to vector<64x128xf32>
    %8 = arith.maximumf %6, %7 : vector<64x128xf32>
    %c0_7 = arith.constant 0 : index
    %c0_8 = arith.constant 0 : index
    %9 = vector.load %arg4[%c0_7, %c0_8] : memref<128x512xf32, #tpu.memory_space<vmem>>, vector<128x512xf32>
    %cst_9 = arith.constant dense<0.000000e+00> : vector<64x512xf32>
    %10 = tpu.matmul %8, %9, %cst_9 {dimension_numbers = #tpu.dot_dimension_numbers<[1], [0], [0], [1], [0, 0, 1, 1], [], []>} : vector<64x128xf32>, vector<128x512xf32>, vector<64x512xf32> -> vector<64x512xf32>
    %c0_10 = arith.constant 0 : index
    %c0_11 = arith.constant 0 : index
    %11 = vector.load %arg6[%c0_10, %c0_11] : memref<1x512xf32, #tpu.memory_space<vmem>>, vector<1x512xf32>
    %12 = vector.broadcast %11 : vector<1x512xf32> to vector<64x512xf32>
    %13 = arith.addf %10, %12 : vector<64x512xf32>
    %14 = vector.shape_cast %13 : vector<64x512xf32> to vector<8x8x512xf32>
    %c0_12 = arith.constant 0 : index
    %c0_13 = arith.constant 0 : index
    %c0_14 = arith.constant 0 : index
    %15 = vector.load %arg10[%c0_12, %c0_13, %c0_14] : memref<8x8x512xf32, #tpu.memory_space<vmem>>, vector<8x8x512xf32>
    tpu.vector_store %arg10[%c0_12, %c0_13, %c0_14], %14 {strides = array<i32>} : memref<8x8x512xf32, #tpu.memory_space<vmem>>, vector<8x8x512xf32>,
    %cst_15 = arith.constant 0.000000e+00 : f32
    %16 = vector.broadcast %cst_15 : f32 to vector<8x128xf32>
    %cst_16 = arith.constant 0.000000e+00 : f32
    %17 = vector.broadcast %cst_16 : f32 to vector<8x128xf32>
    %c0_i32 = arith.constant 0 : i32
    %18 = arith.index_cast %c0_i32 : i32 to index
    %c0_17 = arith.constant 0 : index
    %c0_18 = arith.constant 0 : index
    %19 = vector.load %arg10[%18, %c0_17, %c0_18] : memref<8x8x512xf32, #tpu.memory_space<vmem>>, vector<1x8x512xf32>
    %20 = vector.shape_cast %19 : vector<1x8x512xf32> to vector<8x512xf32>
    %c0_19 = arith.constant 0 : index
    %c0_20 = arith.constant 0 : index
    %21 = vector.load %arg5[%c0_19, %c0_20] : memref<128x512xf32, #tpu.memory_space<vmem>>, vector<128x512xf32>
    %cst_21 = arith.constant dense<0.000000e+00> : vector<8x512xf32>
    %22 = tpu.matmul %16, %21, %cst_21 {dimension_numbers = #tpu.dot_dimension_numbers<[1], [0], [0], [1], [0, 0, 1, 1], [], []>} : vector<8x128xf32>, vector<128x512xf32>, vector<8x512xf32> -> vector<8x512xf32>
    %23 = arith.addf %20, %22 : vector<8x512xf32>
    %24 = vector.extract_strided_slice %23 {offsets = [0, 0], sizes = [8, 128], strides = [1, 1]} : vector<8x512xf32> to vector<8x128xf32>
    %25 = arith.negf %24 : vector<8x128xf32>
    %26 = math.exp %25 : vector<8x128xf32>
    %cst_22 = arith.constant 1.000000e+00 : f32
    %27 = vector.broadcast %cst_22 : f32 to vector<8x128xf32>
    %28 = arith.addf %27, %26 : vector<8x128xf32>
    %29 = arith.divf %27, %28 : vector<8x128xf32>
    %30 = vector.extract_strided_slice %23 {offsets = [0, 128], sizes = [8, 128], strides = [1, 1]} : vector<8x512xf32> to vector<8x128xf32>
    %31 = arith.negf %30 : vector<8x128xf32>
    %32 = math.exp %31 : vector<8x128xf32>
    %cst_23 = arith.constant 1.000000e+00 : f32
    %33 = vector.broadcast %cst_23 : f32 to vector<8x128xf32>
    %34 = arith.addf %33, %32 : vector<8x128xf32>
    %35 = arith.divf %33, %34 : vector<8x128xf32>
    %36 = vector.extract_strided_slice %23 {offsets = [0, 256], sizes = [8, 128], strides = [1, 1]} : vector<8x512xf32> to vector<8x128xf32>
    %37 = math.tanh %36 : vector<8x128xf32>
    %38 = vector.extract_strided_slice %23 {offsets = [0, 384], sizes = [8, 128], strides = [1, 1]} : vector<8x512xf32> to vector<8x128xf32>
    %39 = arith.negf %38 : vector<8x128xf32>
    %40 = math.exp %39 : vector<8x128xf32>
    %cst_24 = arith.constant 1.000000e+00 : f32
    %41 = vector.broadcast %cst_24 : f32 to vector<8x128xf32>
    %42 = arith.addf %41, %40 : vector<8x128xf32>
    %43 = arith.divf %41, %42 : vector<8x128xf32>
    %44 = arith.mulf %35, %17 : vector<8x128xf32>
    %45 = arith.mulf %29, %37 : vector<8x128xf32>
    %46 = arith.addf %44, %45 : vector<8x128xf32>
    %47 = math.tanh %46 : vector<8x128xf32>
    %48 = arith.mulf %43, %47 : vector<8x128xf32>
    %c1_i32 = arith.constant 1 : i32
    %49 = arith.index_cast %c1_i32 : i32 to index
    %c0_25 = arith.constant 0 : index
    %c0_26 = arith.constant 0 : index
    %50 = vector.load %arg10[%49, %c0_25, %c0_26] : memref<8x8x512xf32, #tpu.memory_space<vmem>>, vector<1x8x512xf32>
    %51 = vector.shape_cast %50 : vector<1x8x512xf32> to vector<8x512xf32>
    %c0_27 = arith.constant 0 : index
    %c0_28 = arith.constant 0 : index
    %52 = vector.load %arg5[%c0_27, %c0_28] : memref<128x512xf32, #tpu.memory_space<vmem>>, vector<128x512xf32>
    %cst_29 = arith.constant dense<0.000000e+00> : vector<8x512xf32>
    %53 = tpu.matmul %48, %52, %cst_29 {dimension_numbers = #tpu.dot_dimension_numbers<[1], [0], [0], [1], [0, 0, 1, 1], [], []>} : vector<8x128xf32>, vector<128x512xf32>, vector<8x512xf32> -> vector<8x512xf32>
    %54 = arith.addf %51, %53 : vector<8x512xf32>
    %55 = vector.extract_strided_slice %54 {offsets = [0, 0], sizes = [8, 128], strides = [1, 1]} : vector<8x512xf32> to vector<8x128xf32>
    %56 = arith.negf %55 : vector<8x128xf32>
    %57 = math.exp %56 : vector<8x128xf32>
    %cst_30 = arith.constant 1.000000e+00 : f32
    %58 = vector.broadcast %cst_30 : f32 to vector<8x128xf32>
    %59 = arith.addf %58, %57 : vector<8x128xf32>
    %60 = arith.divf %58, %59 : vector<8x128xf32>
    %61 = vector.extract_strided_slice %54 {offsets = [0, 128], sizes = [8, 128], strides = [1, 1]} : vector<8x512xf32> to vector<8x128xf32>
    %62 = arith.negf %61 : vector<8x128xf32>
    %63 = math.exp %62 : vector<8x128xf32>
    %cst_31 = arith.constant 1.000000e+00 : f32
    %64 = vector.broadcast %cst_31 : f32 to vector<8x128xf32>
    %65 = arith.addf %64, %63 : vector<8x128xf32>
    %66 = arith.divf %64, %65 : vector<8x128xf32>
    %67 = vector.extract_strided_slice %54 {offsets = [0, 256], sizes = [8, 128], strides = [1, 1]} : vector<8x512xf32> to vector<8x128xf32>
    %68 = math.tanh %67 : vector<8x128xf32>
    %69 = vector.extract_strided_slice %54 {offsets = [0, 384], sizes = [8, 128], strides = [1, 1]} : vector<8x512xf32> to vector<8x128xf32>
    %70 = arith.negf %69 : vector<8x128xf32>
    %71 = math.exp %70 : vector<8x128xf32>
    %cst_32 = arith.constant 1.000000e+00 : f32
    %72 = vector.broadcast %cst_32 : f32 to vector<8x128xf32>
    %73 = arith.addf %72, %71 : vector<8x128xf32>
    %74 = arith.divf %72, %73 : vector<8x128xf32>
    %75 = arith.mulf %66, %46 : vector<8x128xf32>
    %76 = arith.mulf %60, %68 : vector<8x128xf32>
    %77 = arith.addf %75, %76 : vector<8x128xf32>
    %78 = math.tanh %77 : vector<8x128xf32>
    %79 = arith.mulf %74, %78 : vector<8x128xf32>
    %c2_i32 = arith.constant 2 : i32
    %80 = arith.index_cast %c2_i32 : i32 to index
    %c0_33 = arith.constant 0 : index
    %c0_34 = arith.constant 0 : index
    %81 = vector.load %arg10[%80, %c0_33, %c0_34] : memref<8x8x512xf32, #tpu.memory_space<vmem>>, vector<1x8x512xf32>
    %82 = vector.shape_cast %81 : vector<1x8x512xf32> to vector<8x512xf32>
    %c0_35 = arith.constant 0 : index
    %c0_36 = arith.constant 0 : index
    %83 = vector.load %arg5[%c0_35, %c0_36] : memref<128x512xf32, #tpu.memory_space<vmem>>, vector<128x512xf32>
    %cst_37 = arith.constant dense<0.000000e+00> : vector<8x512xf32>
    %84 = tpu.matmul %79, %83, %cst_37 {dimension_numbers = #tpu.dot_dimension_numbers<[1], [0], [0], [1], [0, 0, 1, 1], [], []>} : vector<8x128xf32>, vector<128x512xf32>, vector<8x512xf32> -> vector<8x512xf32>
    %85 = arith.addf %82, %84 : vector<8x512xf32>
    %86 = vector.extract_strided_slice %85 {offsets = [0, 0], sizes = [8, 128], strides = [1, 1]} : vector<8x512xf32> to vector<8x128xf32>
    %87 = arith.negf %86 : vector<8x128xf32>
    %88 = math.exp %87 : vector<8x128xf32>
    %cst_38 = arith.constant 1.000000e+00 : f32
    %89 = vector.broadcast %cst_38 : f32 to vector<8x128xf32>
    %90 = arith.addf %89, %88 : vector<8x128xf32>
    %91 = arith.divf %89, %90 : vector<8x128xf32>
    %92 = vector.extract_strided_slice %85 {offsets = [0, 128], sizes = [8, 128], strides = [1, 1]} : vector<8x512xf32> to vector<8x128xf32>
    %93 = arith.negf %92 : vector<8x128xf32>
    %94 = math.exp %93 : vector<8x128xf32>
    %cst_39 = arith.constant 1.000000e+00 : f32
    %95 = vector.broadcast %cst_39 : f32 to vector<8x128xf32>
    %96 = arith.addf %95, %94 : vector<8x128xf32>
    %97 = arith.divf %95, %96 : vector<8x128xf32>
    %98 = vector.extract_strided_slice %85 {offsets = [0, 256], sizes = [8, 128], strides = [1, 1]} : vector<8x512xf32> to vector<8x128xf32>
    %99 = math.tanh %98 : vector<8x128xf32>
    %100 = vector.extract_strided_slice %85 {offsets = [0, 384], sizes = [8, 128], strides = [1, 1]} : vector<8x512xf32> to vector<8x128xf32>
    %101 = arith.negf %100 : vector<8x128xf32>
    %102 = math.exp %101 : vector<8x128xf32>
    %cst_40 = arith.constant 1.000000e+00 : f32
    %103 = vector.broadcast %cst_40 : f32 to vector<8x128xf32>
    %104 = arith.addf %103, %102 : vector<8x128xf32>
    %105 = arith.divf %103, %104 : vector<8x128xf32>
    %106 = arith.mulf %97, %77 : vector<8x128xf32>
    %107 = arith.mulf %91, %99 : vector<8x128xf32>
    %108 = arith.addf %106, %107 : vector<8x128xf32>
    %109 = math.tanh %108 : vector<8x128xf32>
    %110 = arith.mulf %105, %109 : vector<8x128xf32>
    %c3_i32 = arith.constant 3 : i32
    %111 = arith.index_cast %c3_i32 : i32 to index
    %c0_41 = arith.constant 0 : index
    %c0_42 = arith.constant 0 : index
    %112 = vector.load %arg10[%111, %c0_41, %c0_42] : memref<8x8x512xf32, #tpu.memory_space<vmem>>, vector<1x8x512xf32>
    %113 = vector.shape_cast %112 : vector<1x8x512xf32> to vector<8x512xf32>
    %c0_43 = arith.constant 0 : index
    %c0_44 = arith.constant 0 : index
    %114 = vector.load %arg5[%c0_43, %c0_44] : memref<128x512xf32, #tpu.memory_space<vmem>>, vector<128x512xf32>
    %cst_45 = arith.constant dense<0.000000e+00> : vector<8x512xf32>
    %115 = tpu.matmul %110, %114, %cst_45 {dimension_numbers = #tpu.dot_dimension_numbers<[1], [0], [0], [1], [0, 0, 1, 1], [], []>} : vector<8x128xf32>, vector<128x512xf32>, vector<8x512xf32> -> vector<8x512xf32>
    %116 = arith.addf %113, %115 : vector<8x512xf32>
    %117 = vector.extract_strided_slice %116 {offsets = [0, 0], sizes = [8, 128], strides = [1, 1]} : vector<8x512xf32> to vector<8x128xf32>
    %118 = arith.negf %117 : vector<8x128xf32>
    %119 = math.exp %118 : vector<8x128xf32>
    %cst_46 = arith.constant 1.000000e+00 : f32
    %120 = vector.broadcast %cst_46 : f32 to vector<8x128xf32>
    %121 = arith.addf %120, %119 : vector<8x128xf32>
    %122 = arith.divf %120, %121 : vector<8x128xf32>
    %123 = vector.extract_strided_slice %116 {offsets = [0, 128], sizes = [8, 128], strides = [1, 1]} : vector<8x512xf32> to vector<8x128xf32>
    %124 = arith.negf %123 : vector<8x128xf32>
    %125 = math.exp %124 : vector<8x128xf32>
    %cst_47 = arith.constant 1.000000e+00 : f32
    %126 = vector.broadcast %cst_47 : f32 to vector<8x128xf32>
    %127 = arith.addf %126, %125 : vector<8x128xf32>
    %128 = arith.divf %126, %127 : vector<8x128xf32>
    %129 = vector.extract_strided_slice %116 {offsets = [0, 256], sizes = [8, 128], strides = [1, 1]} : vector<8x512xf32> to vector<8x128xf32>
    %130 = math.tanh %129 : vector<8x128xf32>
    %131 = vector.extract_strided_slice %116 {offsets = [0, 384], sizes = [8, 128], strides = [1, 1]} : vector<8x512xf32> to vector<8x128xf32>
    %132 = arith.negf %131 : vector<8x128xf32>
    %133 = math.exp %132 : vector<8x128xf32>
    %cst_48 = arith.constant 1.000000e+00 : f32
    %134 = vector.broadcast %cst_48 : f32 to vector<8x128xf32>
    %135 = arith.addf %134, %133 : vector<8x128xf32>
    %136 = arith.divf %134, %135 : vector<8x128xf32>
    %137 = arith.mulf %128, %108 : vector<8x128xf32>
    %138 = arith.mulf %122, %130 : vector<8x128xf32>
    %139 = arith.addf %137, %138 : vector<8x128xf32>
    %140 = math.tanh %139 : vector<8x128xf32>
    %141 = arith.mulf %136, %140 : vector<8x128xf32>
    %c4_i32 = arith.constant 4 : i32
    %142 = arith.index_cast %c4_i32 : i32 to index
    %c0_49 = arith.constant 0 : index
    %c0_50 = arith.constant 0 : index
    %143 = vector.load %arg10[%142, %c0_49, %c0_50] : memref<8x8x512xf32, #tpu.memory_space<vmem>>, vector<1x8x512xf32>
    %144 = vector.shape_cast %143 : vector<1x8x512xf32> to vector<8x512xf32>
    %c0_51 = arith.constant 0 : index
    %c0_52 = arith.constant 0 : index
    %145 = vector.load %arg5[%c0_51, %c0_52] : memref<128x512xf32, #tpu.memory_space<vmem>>, vector<128x512xf32>
    %cst_53 = arith.constant dense<0.000000e+00> : vector<8x512xf32>
    %146 = tpu.matmul %141, %145, %cst_53 {dimension_numbers = #tpu.dot_dimension_numbers<[1], [0], [0], [1], [0, 0, 1, 1], [], []>} : vector<8x128xf32>, vector<128x512xf32>, vector<8x512xf32> -> vector<8x512xf32>
    %147 = arith.addf %144, %146 : vector<8x512xf32>
    %148 = vector.extract_strided_slice %147 {offsets = [0, 0], sizes = [8, 128], strides = [1, 1]} : vector<8x512xf32> to vector<8x128xf32>
    %149 = arith.negf %148 : vector<8x128xf32>
    %150 = math.exp %149 : vector<8x128xf32>
    %cst_54 = arith.constant 1.000000e+00 : f32
    %151 = vector.broadcast %cst_54 : f32 to vector<8x128xf32>
    %152 = arith.addf %151, %150 : vector<8x128xf32>
    %153 = arith.divf %151, %152 : vector<8x128xf32>
    %154 = vector.extract_strided_slice %147 {offsets = [0, 128], sizes = [8, 128], strides = [1, 1]} : vector<8x512xf32> to vector<8x128xf32>
    %155 = arith.negf %154 : vector<8x128xf32>
    %156 = math.exp %155 : vector<8x128xf32>
    %cst_55 = arith.constant 1.000000e+00 : f32
    %157 = vector.broadcast %cst_55 : f32 to vector<8x128xf32>
    %158 = arith.addf %157, %156 : vector<8x128xf32>
    %159 = arith.divf %157, %158 : vector<8x128xf32>
    %160 = vector.extract_strided_slice %147 {offsets = [0, 256], sizes = [8, 128], strides = [1, 1]} : vector<8x512xf32> to vector<8x128xf32>
    %161 = math.tanh %160 : vector<8x128xf32>
    %162 = vector.extract_strided_slice %147 {offsets = [0, 384], sizes = [8, 128], strides = [1, 1]} : vector<8x512xf32> to vector<8x128xf32>
    %163 = arith.negf %162 : vector<8x128xf32>
    %164 = math.exp %163 : vector<8x128xf32>
    %cst_56 = arith.constant 1.000000e+00 : f32
    %165 = vector.broadcast %cst_56 : f32 to vector<8x128xf32>
    %166 = arith.addf %165, %164 : vector<8x128xf32>
    %167 = arith.divf %165, %166 : vector<8x128xf32>
    %168 = arith.mulf %159, %139 : vector<8x128xf32>
    %169 = arith.mulf %153, %161 : vector<8x128xf32>
    %170 = arith.addf %168, %169 : vector<8x128xf32>
    %171 = math.tanh %170 : vector<8x128xf32>
    %172 = arith.mulf %167, %171 : vector<8x128xf32>
    %c5_i32 = arith.constant 5 : i32
    %173 = arith.index_cast %c5_i32 : i32 to index
    %c0_57 = arith.constant 0 : index
    %c0_58 = arith.constant 0 : index
    %174 = vector.load %arg10[%173, %c0_57, %c0_58] : memref<8x8x512xf32, #tpu.memory_space<vmem>>, vector<1x8x512xf32>
    %175 = vector.shape_cast %174 : vector<1x8x512xf32> to vector<8x512xf32>
    %c0_59 = arith.constant 0 : index
    %c0_60 = arith.constant 0 : index
    %176 = vector.load %arg5[%c0_59, %c0_60] : memref<128x512xf32, #tpu.memory_space<vmem>>, vector<128x512xf32>
    %cst_61 = arith.constant dense<0.000000e+00> : vector<8x512xf32>
    %177 = tpu.matmul %172, %176, %cst_61 {dimension_numbers = #tpu.dot_dimension_numbers<[1], [0], [0], [1], [0, 0, 1, 1], [], []>} : vector<8x128xf32>, vector<128x512xf32>, vector<8x512xf32> -> vector<8x512xf32>
    %178 = arith.addf %175, %177 : vector<8x512xf32>
    %179 = vector.extract_strided_slice %178 {offsets = [0, 0], sizes = [8, 128], strides = [1, 1]} : vector<8x512xf32> to vector<8x128xf32>
    %180 = arith.negf %179 : vector<8x128xf32>
    %181 = math.exp %180 : vector<8x128xf32>
    %cst_62 = arith.constant 1.000000e+00 : f32
    %182 = vector.broadcast %cst_62 : f32 to vector<8x128xf32>
    %183 = arith.addf %182, %181 : vector<8x128xf32>
    %184 = arith.divf %182, %183 : vector<8x128xf32>
    %185 = vector.extract_strided_slice %178 {offsets = [0, 128], sizes = [8, 128], strides = [1, 1]} : vector<8x512xf32> to vector<8x128xf32>
    %186 = arith.negf %185 : vector<8x128xf32>
    %187 = math.exp %186 : vector<8x128xf32>
    %cst_63 = arith.constant 1.000000e+00 : f32
    %188 = vector.broadcast %cst_63 : f32 to vector<8x128xf32>
    %189 = arith.addf %188, %187 : vector<8x128xf32>
    %190 = arith.divf %188, %189 : vector<8x128xf32>
    %191 = vector.extract_strided_slice %178 {offsets = [0, 256], sizes = [8, 128], strides = [1, 1]} : vector<8x512xf32> to vector<8x128xf32>
    %192 = math.tanh %191 : vector<8x128xf32>
    %193 = vector.extract_strided_slice %178 {offsets = [0, 384], sizes = [8, 128], strides = [1, 1]} : vector<8x512xf32> to vector<8x128xf32>
    %194 = arith.negf %193 : vector<8x128xf32>
    %195 = math.exp %194 : vector<8x128xf32>
    %cst_64 = arith.constant 1.000000e+00 : f32
    %196 = vector.broadcast %cst_64 : f32 to vector<8x128xf32>
    %197 = arith.addf %196, %195 : vector<8x128xf32>
    %198 = arith.divf %196, %197 : vector<8x128xf32>
    %199 = arith.mulf %190, %170 : vector<8x128xf32>
    %200 = arith.mulf %184, %192 : vector<8x128xf32>
    %201 = arith.addf %199, %200 : vector<8x128xf32>
    %202 = math.tanh %201 : vector<8x128xf32>
    %203 = arith.mulf %198, %202 : vector<8x128xf32>
    %c6_i32 = arith.constant 6 : i32
    %204 = arith.index_cast %c6_i32 : i32 to index
    %c0_65 = arith.constant 0 : index
    %c0_66 = arith.constant 0 : index
    %205 = vector.load %arg10[%204, %c0_65, %c0_66] : memref<8x8x512xf32, #tpu.memory_space<vmem>>, vector<1x8x512xf32>
    %206 = vector.shape_cast %205 : vector<1x8x512xf32> to vector<8x512xf32>
    %c0_67 = arith.constant 0 : index
    %c0_68 = arith.constant 0 : index
    %207 = vector.load %arg5[%c0_67, %c0_68] : memref<128x512xf32, #tpu.memory_space<vmem>>, vector<128x512xf32>
    %cst_69 = arith.constant dense<0.000000e+00> : vector<8x512xf32>
    %208 = tpu.matmul %203, %207, %cst_69 {dimension_numbers = #tpu.dot_dimension_numbers<[1], [0], [0], [1], [0, 0, 1, 1], [], []>} : vector<8x128xf32>, vector<128x512xf32>, vector<8x512xf32> -> vector<8x512xf32>
    %209 = arith.addf %206, %208 : vector<8x512xf32>
    %210 = vector.extract_strided_slice %209 {offsets = [0, 0], sizes = [8, 128], strides = [1, 1]} : vector<8x512xf32> to vector<8x128xf32>
    %211 = arith.negf %210 : vector<8x128xf32>
    %212 = math.exp %211 : vector<8x128xf32>
    %cst_70 = arith.constant 1.000000e+00 : f32
    %213 = vector.broadcast %cst_70 : f32 to vector<8x128xf32>
    %214 = arith.addf %213, %212 : vector<8x128xf32>
    %215 = arith.divf %213, %214 : vector<8x128xf32>
    %216 = vector.extract_strided_slice %209 {offsets = [0, 128], sizes = [8, 128], strides = [1, 1]} : vector<8x512xf32> to vector<8x128xf32>
    %217 = arith.negf %216 : vector<8x128xf32>
    %218 = math.exp %217 : vector<8x128xf32>
    %cst_71 = arith.constant 1.000000e+00 : f32
    %219 = vector.broadcast %cst_71 : f32 to vector<8x128xf32>
    %220 = arith.addf %219, %218 : vector<8x128xf32>
    %221 = arith.divf %219, %220 : vector<8x128xf32>
    %222 = vector.extract_strided_slice %209 {offsets = [0, 256], sizes = [8, 128], strides = [1, 1]} : vector<8x512xf32> to vector<8x128xf32>
    %223 = math.tanh %222 : vector<8x128xf32>
    %224 = vector.extract_strided_slice %209 {offsets = [0, 384], sizes = [8, 128], strides = [1, 1]} : vector<8x512xf32> to vector<8x128xf32>
    %225 = arith.negf %224 : vector<8x128xf32>
    %226 = math.exp %225 : vector<8x128xf32>
    %cst_72 = arith.constant 1.000000e+00 : f32
    %227 = vector.broadcast %cst_72 : f32 to vector<8x128xf32>
    %228 = arith.addf %227, %226 : vector<8x128xf32>
    %229 = arith.divf %227, %228 : vector<8x128xf32>
    %230 = arith.mulf %221, %201 : vector<8x128xf32>
    %231 = arith.mulf %215, %223 : vector<8x128xf32>
    %232 = arith.addf %230, %231 : vector<8x128xf32>
    %233 = math.tanh %232 : vector<8x128xf32>
    %234 = arith.mulf %229, %233 : vector<8x128xf32>
    %c7_i32 = arith.constant 7 : i32
    %235 = arith.index_cast %c7_i32 : i32 to index
    %c0_73 = arith.constant 0 : index
    %c0_74 = arith.constant 0 : index
    %236 = vector.load %arg10[%235, %c0_73, %c0_74] : memref<8x8x512xf32, #tpu.memory_space<vmem>>, vector<1x8x512xf32>
    %237 = vector.shape_cast %236 : vector<1x8x512xf32> to vector<8x512xf32>
    %c0_75 = arith.constant 0 : index
    %c0_76 = arith.constant 0 : index
    %238 = vector.load %arg5[%c0_75, %c0_76] : memref<128x512xf32, #tpu.memory_space<vmem>>, vector<128x512xf32>
    %cst_77 = arith.constant dense<0.000000e+00> : vector<8x512xf32>
    %239 = tpu.matmul %234, %238, %cst_77 {dimension_numbers = #tpu.dot_dimension_numbers<[1], [0], [0], [1], [0, 0, 1, 1], [], []>} : vector<8x128xf32>, vector<128x512xf32>, vector<8x512xf32> -> vector<8x512xf32>
    %240 = arith.addf %237, %239 : vector<8x512xf32>
    %241 = vector.extract_strided_slice %240 {offsets = [0, 0], sizes = [8, 128], strides = [1, 1]} : vector<8x512xf32> to vector<8x128xf32>
    %242 = arith.negf %241 : vector<8x128xf32>
    %243 = math.exp %242 : vector<8x128xf32>
    %cst_78 = arith.constant 1.000000e+00 : f32
    %244 = vector.broadcast %cst_78 : f32 to vector<8x128xf32>
    %245 = arith.addf %244, %243 : vector<8x128xf32>
    %246 = arith.divf %244, %245 : vector<8x128xf32>
    %247 = vector.extract_strided_slice %240 {offsets = [0, 128], sizes = [8, 128], strides = [1, 1]} : vector<8x512xf32> to vector<8x128xf32>
    %248 = arith.negf %247 : vector<8x128xf32>
    %249 = math.exp %248 : vector<8x128xf32>
    %cst_79 = arith.constant 1.000000e+00 : f32
    %250 = vector.broadcast %cst_79 : f32 to vector<8x128xf32>
    %251 = arith.addf %250, %249 : vector<8x128xf32>
    %252 = arith.divf %250, %251 : vector<8x128xf32>
    %253 = vector.extract_strided_slice %240 {offsets = [0, 256], sizes = [8, 128], strides = [1, 1]} : vector<8x512xf32> to vector<8x128xf32>
    %254 = math.tanh %253 : vector<8x128xf32>
    %255 = vector.extract_strided_slice %240 {offsets = [0, 384], sizes = [8, 128], strides = [1, 1]} : vector<8x512xf32> to vector<8x128xf32>
    %256 = arith.negf %255 : vector<8x128xf32>
    %257 = math.exp %256 : vector<8x128xf32>
    %cst_80 = arith.constant 1.000000e+00 : f32
    %258 = vector.broadcast %cst_80 : f32 to vector<8x128xf32>
    %259 = arith.addf %258, %257 : vector<8x128xf32>
    %260 = arith.divf %258, %259 : vector<8x128xf32>
    %261 = arith.mulf %252, %232 : vector<8x128xf32>
    %262 = arith.mulf %246, %254 : vector<8x128xf32>
    %263 = arith.addf %261, %262 : vector<8x128xf32>
    %264 = math.tanh %263 : vector<8x128xf32>
    %265 = arith.mulf %260, %264 : vector<8x128xf32>
    %c8_i32 = arith.constant 8 : i32
    %c0_81 = arith.constant 0 : index
    %c0_82 = arith.constant 0 : index
    %266 = vector.load %arg7[%c0_81, %c0_82] : memref<1x128xf32, #tpu.memory_space<vmem>>, vector<1x128xf32>
    %267 = vector.broadcast %266 : vector<1x128xf32> to vector<8x128xf32>
    %268 = arith.mulf %265, %267 : vector<8x128xf32>
    %cst_83 = arith.constant dense<0.000000e+00> : vector<8xf32>
    %269 = vector.multi_reduction <add>, %268, %cst_83 [1] : vector<8x128xf32> to vector<8xf32>
    %270 = vector.shape_cast %269 : vector<8xf32> to vector<8x1xf32>
    %c0_84 = arith.constant 0 : index
    %c0_85 = arith.constant 0 : index
    %271 = vector.load %arg8[%c0_84, %c0_85] : memref<1x128xf32, #tpu.memory_space<vmem>>, vector<1x128xf32>
    %272 = vector.broadcast %270 : vector<8x1xf32> to vector<8x128xf32>
    %273 = vector.broadcast %271 : vector<1x128xf32> to vector<8x128xf32>
    %274 = arith.addf %272, %273 : vector<8x128xf32>
    %c0_86 = arith.constant 0 : index
    %c0_87 = arith.constant 0 : index
    %275 = vector.load %arg9[%c0_86, %c0_87] : memref<8x128xf32, #tpu.memory_space<vmem>>, vector<8x128xf32>
    tpu.vector_store %arg9[%c0_86, %c0_87], %274 {strides = array<i32>} : memref<8x128xf32, #tpu.memory_space<vmem>>, vector<8x128xf32>,
    return
  }
  func.func @transform_0(%arg0: i32) -> (i32, i32, i32) {
    %c0_i32 = arith.constant 0 : i32
    %c0_i32_0 = arith.constant 0 : i32
    %c0_i32_1 = arith.constant 0 : i32
    return %c0_i32, %arg0, %c0_i32_0 : i32, i32, i32
  }
  func.func @transform_1(%arg0: i32) -> (i32, i32) {
    %c0_i32 = arith.constant 0 : i32
    %c0_i32_0 = arith.constant 0 : i32
    %c0_i32_1 = arith.constant 0 : i32
    return %c0_i32, %c0_i32_0 : i32, i32
  }
  func.func @transform_2(%arg0: i32) -> (i32, i32) {
    %c0_i32 = arith.constant 0 : i32
    %c0_i32_0 = arith.constant 0 : i32
    %c0_i32_1 = arith.constant 0 : i32
    return %c0_i32, %c0_i32_0 : i32, i32
  }
  func.func @transform_3(%arg0: i32) -> (i32, i32) {
    %c0_i32 = arith.constant 0 : i32
    %c0_i32_0 = arith.constant 0 : i32
    %c0_i32_1 = arith.constant 0 : i32
    return %c0_i32, %c0_i32_0 : i32, i32
  }
  func.func @transform_4(%arg0: i32) -> (i32, i32) {
    %c0_i32 = arith.constant 0 : i32
    %c0_i32_0 = arith.constant 0 : i32
    %c0_i32_1 = arith.constant 0 : i32
    return %c0_i32, %c0_i32_0 : i32, i32
  }
  func.func @transform_5(%arg0: i32) -> (i32, i32) {
    %c0_i32 = arith.constant 0 : i32
    %c0_i32_0 = arith.constant 0 : i32
    %c0_i32_1 = arith.constant 0 : i32
    return %c0_i32, %c0_i32_0 : i32, i32
  }
  func.func @transform_6(%arg0: i32) -> (i32, i32) {
    %c0_i32 = arith.constant 0 : i32
    %c0_i32_0 = arith.constant 0 : i32
    %c0_i32_1 = arith.constant 0 : i32
    return %c0_i32, %c0_i32_0 : i32, i32
  }
  func.func @transform_7(%arg0: i32) -> (i32, i32) {
    %c0_i32 = arith.constant 0 : i32
    %c0_i32_0 = arith.constant 0 : i32
    %c0_i32_1 = arith.constant 0 : i32
    return %c0_i32, %c0_i32_0 : i32, i32
  }
  func.func @transform_8(%arg0: i32) -> (i32, i32) {
    %c0_i32 = arith.constant 0 : i32
    %c0_i32_0 = arith.constant 0 : i32
    return %arg0, %c0_i32 : i32, i32
  }
}

</mosaic_0001>

<bundles_post_ra>
// kernel: tpu_custom_call.1
= control target key start
LH: loop header
LB: loop body
LE: loop exit
PB: predicated region body
PF: predicated region fallthrough
CT: control target
= control target key end

     0   :  { %13 = vsyncpa [#allocation4], 0  ;;  %s3663_s0 = inlined_call_operand.hbm [shape: f32[8,8,128], index: 0, kind: input, shape index: {}]   ;;  %s3664_s1 = inlined_call_operand.hbm [shape: f32[128,128], index: 1, kind: input, shape index: {}]   ;;  %s3665_s2 = inlined_call_operand.vmem [shape: f32[1,128], index: 2, kind: input, shape index: {}]   ;;  %s3666_s3 = inlined_call_operand.hbm [shape: f32[128,512], index: 3, kind: input, shape index: {}]   ;;  %s3667_s4 = inlined_call_operand.hbm [shape: f32[128,512], index: 4, kind: input, shape index: {}]   ;;  %s3668_s5 = inlined_call_operand.vmem [shape: f32[1,512], index: 5, kind: input, shape index: {}]   ;;  %s3669_s6 = inlined_call_operand.vmem [shape: f32[1,128], index: 6, kind: input, shape index: {}]   ;;  %s3670_s7 = inlined_call_operand.vmem [shape: f32[1,128], index: 7, kind: input, shape index: {}]   ;;  %s3671_s8 = inlined_call_operand.hbm [shape: f32[8,128], index: 8, kind: output, shape index: {}]  }
   0x1   :  { %14 = vsyncpa [#allocation7], 0 }
   0x2   :  { %15 = vsyncpa [#allocation10], 0 }
   0x3   :  { %16 = vsyncpa [#allocation5], 0  ;;  %s3095_s27 = smov [#allocation6]   ;;  %s3096_s29 = smov [#allocation3]  }
   0x4   :  { %s34_s28 = sshll.u32 %s3095_s27, 4  ;;  %s22_s30 = sshll.u32 %s3096_s29, 4  ;;  %s35_s28 = int_to_ptr.vmem [resolvable:$true] %s34_s28  ;;  %s3150_s30 = int_to_ptr.vmem [resolvable:$true] %s22_s30 }
   0x5   :  { %s2977_s11 = scalar_lea.hbm %s3664_s1, 2048 }
   0x6   :  { %p2978_p0 = scmp.ne.s32.totalorder %s3664_s1, %s2977_s11  ;;  %p2981_p1 = scmp.lt.u32.totalorder %s2977_s11, %s3664_s1 }
   0x8   :  { %p2983_p2 = pnand %p2981_p1, %p2978_p0 }
   0xa   :  { %2986 = shalt.err (!%p2983_p2)
}
   0xb   :  { %s2987_s16 = scalar_lea.vmem %s35_s28, 2048  ;;  %p2992_p4 = scmp.lt.s32.totalorder %s35_s28, %s35_s28 }
   0xc   :  { %p2988_p3 = scmp.ne.s32.totalorder %s35_s28, %s2987_s16  ;;  %p2993_p5 = scmp.lt.s32.totalorder %s2987_s16, %s2987_s16 }
   0xe   :  { %p2994_p6 = por %p2993_p5, %p2992_p4 }
  0x10   :  { %p2995_p7 = pnand %p2994_p6, %p2988_p3 }
  0x12   :  { %2998 = shalt.err (!%p2995_p7)
}
  0x13   :  { %s3097_s17 = smov 128   ;;  %s3098_s18 = smov 8  }
  0x14   :  { %40 = dma.hbm_to_vmem [thread:$0]  %s3664_s1, 2048, %s35_s28, [#allocation7], %s3097_s17, %s3097_s17, %s3098_s18  }
  0x15   :  { %s2999_s23 = scalar_lea.hbm %s3663_s0, 1024 }
  0x16   :  { %p3000_p8 = scmp.ne.s32.totalorder %s3663_s0, %s2999_s23  ;;  %p3003_p9 = scmp.lt.u32.totalorder %s2999_s23, %s3663_s0 }
  0x18   :  { %p3005_p10 = pnand %p3003_p9, %p3000_p8 }
  0x1a   :  { %3008 = shalt.err (!%p3005_p10)
}
  0x1b   :  { %s3009_s29 = scalar_lea.vmem %s3150_s30, 1024  ;;  %p3014_p12 = scmp.lt.s32.totalorder %s3150_s30, %s3150_s30 }
  0x1c   :  { %p3010_p11 = scmp.ne.s32.totalorder %s3150_s30, %s3009_s29  ;;  %p3015_p13 = scmp.lt.s32.totalorder %s3009_s29, %s3009_s29 }
  0x1e   :  { %p3016_p0 = por %p3015_p13, %p3014_p12 }
  0x20   :  { %p3017_p1 = pnand %p3016_p0, %p3010_p11 }
  0x22   :  { %3020 = shalt.err (!%p3017_p1)
}
  0x23   :  { %28 = dma.hbm_to_vmem [thread:$0]  %s3663_s0, 1024, %s3150_s30, [#allocation4], %s3097_s17, %s3097_s17, %s3098_s18  }
  0x24   :  { %s3099_s9 = smov [#allocation8]   ;;  %s3021_s13 = scalar_lea.hbm %s3666_s3, 8192 }
  0x25   :  { %s48_s10 = sshll.u32 %s3099_s9, 4  ;;  %p3022_p2 = scmp.ne.s32.totalorder %s3666_s3, %s3021_s13  ;;  %s49_s10 = int_to_ptr.vmem [resolvable:$true] %s48_s10 }
  0x26   :  { %p3025_p3 = scmp.lt.u32.totalorder %s3021_s13, %s3666_s3 }
  0x28   :  { %p3027_p4 = pnand %p3025_p3, %p3022_p2 }
  0x2a   :  { %3030 = shalt.err (!%p3027_p4)
}
  0x2b   :  { %s3031_s20 = scalar_lea.vmem %s49_s10, 8192  ;;  %p3036_p6 = scmp.lt.s32.totalorder %s49_s10, %s49_s10 }
  0x2c   :  { %p3032_p5 = scmp.ne.s32.totalorder %s49_s10, %s3031_s20  ;;  %p3037_p7 = scmp.lt.s32.totalorder %s3031_s20, %s3031_s20 }
  0x2e   :  { %p3038_p8 = por %p3037_p7, %p3036_p6 }
  0x30   :  { %p3039_p9 = pnand %p3038_p8, %p3032_p5 }
  0x32   :  { %3042 = shalt.err (!%p3039_p9)
}
  0x33   :  { %s3100_s0 = smov 512   ;;  %s3101_s30 = smov 32  }
  0x34   :  { %54 = dma.hbm_to_vmem [thread:$0]  %s3666_s3, 8192, %s49_s10, [#allocation7], %s3100_s0, %s3100_s0, %s3101_s30  }
  0x35   :  { %s3102_s21 = smov [#allocation9]   ;;  %s3043_s25 = scalar_lea.hbm %s3667_s4, 8192 }
  0x36   :  { %s60_s22 = sshll.u32 %s3102_s21, 4  ;;  %p3044_p10 = scmp.ne.s32.totalorder %s3667_s4, %s3043_s25  ;;  %s61_s22 = int_to_ptr.vmem [resolvable:$true] %s60_s22 }
  0x37   :  { %p3047_p11 = scmp.lt.u32.totalorder %s3043_s25, %s3667_s4 }
  0x39   :  { %p3049_p12 = pnand %p3047_p11, %p3044_p10 }
  0x3b   :  { %3052 = shalt.err (!%p3049_p12)
}
  0x3c   :  { %s3053_s28 = scalar_lea.vmem %s61_s22, 8192  ;;  %p3058_p0 = scmp.lt.s32.totalorder %s61_s22, %s61_s22 }
  0x3d   :  { %p3054_p13 = scmp.ne.s32.totalorder %s61_s22, %s3053_s28  ;;  %p3059_p1 = scmp.lt.s32.totalorder %s3053_s28, %s3053_s28 }
  0x3f   :  { %p3060_p2 = por %p3059_p1, %p3058_p0 }
  0x41   :  { %p3061_p3 = pnand %p3060_p2, %p3054_p13 }
  0x43   :  { %3064 = shalt.err (!%p3061_p3)
}
  0x44   :  { %66 = dma.hbm_to_vmem [thread:$0]  %s3667_s4, 8192, %s61_s22, [#allocation10], %s3100_s0, %s3100_s0, %s3101_s30  }
  0x45   :  { %3087 = dma.done.wait [#allocation4], 1024  }
  0x46   :  { %3088 = vsyncadd [#allocation4], 4294966272 }
  0x47   :  { %3089 = dma.done.wait [#allocation7], 10240  }
  0x48   :  { %3090 = vsyncadd [#allocation7], 4294957056 }
  0x49   :  { %3091 = dma.done.wait [#allocation10], 8192  }
  0x4a   :  { %3092 = vsyncadd [#allocation10], 4294959104  ;;  %v93_v0 = vld [vmem:[#allocation6] sm:$0xff]  ;;  %v94_v1 = vld [vmem:[#allocation6 + $0x8] sm:$0xff]  ;;  %s3104_s15 = smov [#allocation11]  }
  0x4b   :  { %v95_v2 = vld [vmem:[#allocation6 + $0x10] sm:$0xff]  ;;  %v2167_v3 = vpack.c.bf16 %v94_v1, %v93_v0  ;;  %v96_v4 = vld [vmem:[#allocation6 + $0x18] sm:$0xff]  ;;  %v97_v6 = vld [vmem:[#allocation6 + $0x20] sm:$0xff]  ;;  %s2061_s16 = sshll.u32 %s3104_s15, 4  ;;  %s2062_s16 = int_to_ptr.vmem [resolvable:$true] %s2061_s16 }
  0x4c   :  { %v2171_v5 = vpack.c.bf16 %v96_v4, %v95_v2  ;;  %v98_v7 = vld [vmem:[#allocation6 + $0x28] sm:$0xff]  ;;  %v85_v9 = vld [vmem:[#allocation3] sm:$0xff]  ;;  %v99_v10 = vld [vmem:[#allocation6 + $0x30] sm:$0xff]  ;;  %s3065_s19 = scalar_lea.vmem %s2062_s16, 128  ;;  %p3070_p5 = scmp.lt.s32.totalorder %s2062_s16, %s2062_s16 }
  0x4d   :  { %2168 = vmatprep.subr.bf16.mxu0 %v2167_v3  ;;  %v2175_v8 = vpack.c.bf16 %v98_v7, %v97_v6  ;;  %v100_v11 = vld [vmem:[#allocation6 + $0x38] sm:$0xff]  ;;  %2155 = vmatprep.mubr.f32.mxu0 %v85_v9  ;;  %v230_v12 = vld [vmem:[#allocation8 + $0x8] sm:$0xff]  ;;  %v229_v14 = vld [vmem:[#allocation8] sm:$0xff]  ;;  %p3066_p4 = scmp.ne.s32.totalorder %s2062_s16, %s3065_s19  ;;  %p3071_p6 = scmp.lt.s32.totalorder %s3065_s19, %s3065_s19 }
  0x4e   :  { %2170 = vmatpush3.bf16.msra.mxu0 %v2167_v3  ;;  %v234_v13 = vld [vmem:[#allocation8 + $0x28] sm:$0xff]  ;;  %v2179_v15 = vpack.c.bf16 %v100_v11, %v99_v10  ;;  %v233_v17 = vld [vmem:[#allocation8 + $0x20] sm:$0xff]  ;;  %v103_v28 = vld [vmem:[#allocation6 + $0x50] sm:$0xff] }
  0x4f   :  { %2172 = vmatprep.subr.bf16.mxu0 %v2171_v5  ;;  %v2199_v16 = vpack.c.bf16 %v234_v13, %v230_v12  ;;  %v101_v18 = vld [vmem:[#allocation6 + $0x40] sm:$0xff]  ;;  %v102_v19 = vld [vmem:[#allocation6 + $0x48] sm:$0xff]  ;;  %v2201_v20 = vpack.c.bf16 %v233_v17, %v229_v14  ;;  %v104_v31 = vld [vmem:[#allocation6 + $0x58] sm:$0xff]  ;;  %p3072_p7 = por %p3071_p6, %p3070_p5 }
  0x50   :  { %v238_v21 = vld [vmem:[#allocation8 + $0x48] sm:$0xff]  ;;  %v237_v23 = vld [vmem:[#allocation8 + $0x40] sm:$0xff]  ;;  %v2183_v27 = vpack.c.bf16 %v102_v19, %v101_v18  ;;  %v2187_v38 = vpack.c.bf16 %v104_v31, %v103_v28  ;;  %v107_v48 = vld [vmem:[#allocation6 + $0x70] sm:$0xff] }
  0x51   :  { %2200 = vmatprep.subr.bf16.mxu1 %v2199_v16  ;;  %v242_v22 = vld [vmem:[#allocation8 + $0x68] sm:$0xff]  ;;  %v241_v24 = vld [vmem:[#allocation8 + $0x60] sm:$0xff]  ;;  %v108_v52 = vld [vmem:[#allocation6 + $0x78] sm:$0xff]  ;;  %p3073_p8 = pnand %p3072_p7, %p3066_p4 }
  0x52   :  { %2174 = vmatpush3.bf16.msra.mxu0 %v2171_v5  ;;  %2202 = vmatpush1.bf16.msra.mxu1 %v2201_v20  ;;  %v2203_v25 = vpack.c.bf16 %v242_v22, %v238_v21  ;;  %v2205_v26 = vpack.c.bf16 %v241_v24, %v237_v23  ;;  %v246_v29 = vld [vmem:[#allocation8 + $0x88] sm:$0xff]  ;;  %v245_v33 = vld [vmem:[#allocation8 + $0x80] sm:$0xff]  ;;  %v2195_v56 = vpack.c.bf16 %v108_v52, %v107_v48  ;;  %v232_v57 = vld [vmem:[#allocation8 + $0x18] sm:$0xff] }
  0x53   :  { %2176 = vmatprep.subr.bf16.mxu0 %v2175_v8  ;;  %v250_v30 = vld [vmem:[#allocation8 + $0xa8] sm:$0xff]  ;;  %v249_v34 = vld [vmem:[#allocation8 + $0xa0] sm:$0xff]  ;;  %v236_v61 = vld [vmem:[#allocation8 + $0x38] sm:$0xff] }
  0x54   :  { %2204 = vmatprep.subr.bf16.mxu1 %v2203_v25  ;;  %v2207_v32 = vpack.c.bf16 %v250_v30, %v246_v29  ;;  %v2209_v35 = vpack.c.bf16 %v249_v34, %v245_v33  ;;  %v254_v36 = vld [vmem:[#allocation8 + $0xc8] sm:$0xff]  ;;  %v253_v40 = vld [vmem:[#allocation8 + $0xc0] sm:$0xff]  ;;  %v2231_v1 = vpack.c.bf16 %v236_v61, %v232_v57  ;;  %v231_v2 = vld [vmem:[#allocation8 + $0x10] sm:$0xff] }
  0x55   :  { %v258_v37 = vld [vmem:[#allocation8 + $0xe8] sm:$0xff]  ;;  %v257_v41 = vld [vmem:[#allocation8 + $0xe0] sm:$0xff]  ;;  %v235_v3 = vld [vmem:[#allocation8 + $0x30] sm:$0xff] }
  0x56   :  { %2178 = vmatpush3.bf16.msra.mxu0 %v2175_v8  ;;  %2206 = vmatpush1.bf16.msra.mxu1 %v2205_v26  ;;  %v2211_v39 = vpack.c.bf16 %v258_v37, %v254_v36  ;;  %v105_v42 = vld [vmem:[#allocation6 + $0x60] sm:$0xff]  ;;  %v106_v43 = vld [vmem:[#allocation6 + $0x68] sm:$0xff]  ;;  %v2213_v46 = vpack.c.bf16 %v257_v41, %v253_v40  ;;  %v240_v4 = vld [vmem:[#allocation8 + $0x58] sm:$0xff]  ;;  %v2233_v10 = vpack.c.bf16 %v235_v3, %v231_v2 }
  0x57   :  { %2180 = vmatprep.subr.bf16.mxu0 %v2179_v15  ;;  %2208 = vmatprep.subr.bf16.mxu1 %v2207_v32  ;;  %v262_v44 = vld [vmem:[#allocation8 + $0x108] sm:$0xff]  ;;  %v2191_v47 = vpack.c.bf16 %v106_v43, %v105_v42  ;;  %v261_v50 = vld [vmem:[#allocation8 + $0x100] sm:$0xff]  ;;  %v244_v6 = vld [vmem:[#allocation8 + $0x78] sm:$0xff] }
  0x58   :  { %v266_v45 = vld [vmem:[#allocation8 + $0x128] sm:$0xff]  ;;  %v265_v51 = vld [vmem:[#allocation8 + $0x120] sm:$0xff]  ;;  %v87_v11 = vld [vmem:[#allocation3 + $0x10] sm:$0xff]  ;;  %v2235_v12 = vpack.c.bf16 %v244_v6, %v240_v4 }
  0x59   :  { %v2215_v49 = vpack.c.bf16 %v266_v45, %v262_v44  ;;  %v270_v53 = vld [vmem:[#allocation8 + $0x148] sm:$0xff]  ;;  %v2217_v55 = vpack.c.bf16 %v265_v51, %v261_v50  ;;  %v269_v59 = vld [vmem:[#allocation8 + $0x140] sm:$0xff]  ;;  %v239_v13 = vld [vmem:[#allocation8 + $0x50] sm:$0xff] }
  0x5a   :  { %2182 = vmatpush3.bf16.msra.mxu0 %v2179_v15  ;;  %2210 = vmatpush1.bf16.msra.mxu1 %v2209_v35  ;;  %v274_v54 = vld [vmem:[#allocation8 + $0x168] sm:$0xff]  ;;  %v273_v60 = vld [vmem:[#allocation8 + $0x160] sm:$0xff]  ;;  %v243_v14 = vld [vmem:[#allocation8 + $0x70] sm:$0xff] }
  0x5b   :  { %2184 = vmatprep.subr.bf16.mxu0 %v2183_v27  ;;  %2212 = vmatprep.subr.bf16.mxu1 %v2211_v39  ;;  %v2219_v58 = vpack.c.bf16 %v274_v54, %v270_v53  ;;  %v278_v62 = vld [vmem:[#allocation8 + $0x188] sm:$0xff]  ;;  %v2221_v0 = vpack.c.bf16 %v273_v60, %v269_v59  ;;  %v277_v7 = vld [vmem:[#allocation8 + $0x180] sm:$0xff]  ;;  %v248_v16 = vld [vmem:[#allocation8 + $0x98] sm:$0xff]  ;;  %v2237_v19 = vpack.c.bf16 %v243_v14, %v239_v13 }
  0x5c   :  { %v282_v63 = vld [vmem:[#allocation8 + $0x1a8] sm:$0xff]  ;;  %v281_v8 = vld [vmem:[#allocation8 + $0x1a0] sm:$0xff]  ;;  %v252_v17 = vld [vmem:[#allocation8 + $0xb8] sm:$0xff] }
  0x5d   :  { %v2223_v5 = vpack.c.bf16 %v282_v63, %v278_v62  ;;  %v86_v9 = vld [vmem:[#allocation3 + $0x8] sm:$0xff]  ;;  %v2225_v15 = vpack.c.bf16 %v281_v8, %v277_v7  ;;  %v88_v18 = vld [vmem:[#allocation3 + $0x18] sm:$0xff]  ;;  %v89_v20 = vld [vmem:[#allocation3 + $0x20] sm:$0xff]  ;;  %v2239_v21 = vpack.c.bf16 %v252_v17, %v248_v16 }
  0x5e   :  { %2186 = vmatpush3.bf16.msra.mxu0 %v2183_v27  ;;  %2214 = vmatpush1.bf16.msra.mxu1 %v2213_v46  ;;  %v247_v22 = vld [vmem:[#allocation8 + $0x90] sm:$0xff]  ;;  %v256_v24 = vld [vmem:[#allocation8 + $0xd8] sm:$0xff]  ;;  %v90_v26 = vld [vmem:[#allocation3 + $0x28] sm:$0xff] }
  0x5f   :  { %2188 = vmatprep.subr.bf16.mxu0 %v2187_v38  ;;  %2216 = vmatprep.subr.bf16.mxu1 %v2215_v49  ;;  %v251_v23 = vld [vmem:[#allocation8 + $0xb0] sm:$0xff]  ;;  %v260_v25 = vld [vmem:[#allocation8 + $0xf8] sm:$0xff]  ;;  %v286_v52 = vld [vmem:[#allocation8 + $0x1c8] sm:$0xff] }
  0x60   :  { %v2241_v27 = vpack.c.bf16 %v251_v23, %v247_v22  ;;  %v91_v28 = vld [vmem:[#allocation3 + $0x30] sm:$0xff]  ;;  %v2243_v29 = vpack.c.bf16 %v260_v25, %v256_v24  ;;  %v264_v32 = vld [vmem:[#allocation8 + $0x118] sm:$0xff]  ;;  %v290_v53 = vld [vmem:[#allocation8 + $0x1e8] sm:$0xff] }
  0x61   :  { %v255_v30 = vld [vmem:[#allocation8 + $0xd0] sm:$0xff]  ;;  %v268_v33 = vld [vmem:[#allocation8 + $0x138] sm:$0xff]  ;;  %v289_v57 = vld [vmem:[#allocation8 + $0x1e0] sm:$0xff] }
  0x62   :  { %2190 = vmatpush3.bf16.msra.mxu0 %v2187_v38  ;;  %2218 = vmatpush1.bf16.msra.mxu1 %v2217_v55  ;;  %v259_v31 = vld [vmem:[#allocation8 + $0xf0] sm:$0xff]  ;;  %v92_v34 = vld [vmem:[#allocation3 + $0x38] sm:$0xff]  ;;  %v2247_v36 = vpack.c.bf16 %v268_v33, %v264_v32  ;;  %v2227_v55 = vpack.c.bf16 %v290_v53, %v286_v52  ;;  %v3216_v7 = vld [vmem:[%s3665_s2] ss:$0 sm:$0xff] }
  0x63   :  { %2192 = vmatprep.subr.bf16.mxu0 %v2191_v47  ;;  %2220 = vmatprep.subr.bf16.mxu1 %v2219_v58  ;;  %v2245_v35 = vpack.c.bf16 %v259_v31, %v255_v30  ;;  %v263_v37 = vld [vmem:[#allocation8 + $0x110] sm:$0xff]  ;;  %v272_v39 = vld [vmem:[#allocation8 + $0x158] sm:$0xff]  ;;  %v577_v8 = vld [vmem:[#allocation9] sm:$0xff] }
  0x64   :  { %v267_v38 = vld [vmem:[#allocation8 + $0x130] sm:$0xff]  ;;  %v276_v40 = vld [vmem:[#allocation8 + $0x178] sm:$0xff]  ;;  %v586_v14 = vld [vmem:[#allocation9 + $0x48] sm:$0xff] }
  0x65   :  { %v2249_v41 = vpack.c.bf16 %v267_v38, %v263_v37  ;;  %v2251_v42 = vpack.c.bf16 %v276_v40, %v272_v39  ;;  %v271_v43 = vld [vmem:[#allocation8 + $0x150] sm:$0xff]  ;;  %v280_v45 = vld [vmem:[#allocation8 + $0x198] sm:$0xff]  ;;  %v590_v16 = vld [vmem:[#allocation9 + $0x68] sm:$0xff] }
  0x66   :  { %2194 = vmatpush3.bf16.msra.mxu0 %v2191_v47  ;;  %2222 = vmatpush1.bf16.msra.mxu1 %v2221_v0  ;;  %v275_v44 = vld [vmem:[#allocation8 + $0x170] sm:$0xff]  ;;  %v284_v46 = vld [vmem:[#allocation8 + $0x1b8] sm:$0xff]  ;;  %v578_v0 = vld [vmem:[#allocation9 + $0x8] sm:$0xff] }
  0x67   :  { %2196 = vmatprep.subr.bf16.mxu0 %v2195_v56  ;;  %2224 = vmatprep.subr.bf16.mxu1 %v2223_v5  ;;  %v2253_v47 = vpack.c.bf16 %v275_v44, %v271_v43  ;;  %v2255_v48 = vpack.c.bf16 %v284_v46, %v280_v45  ;;  %v279_v49 = vld [vmem:[#allocation8 + $0x190] sm:$0xff]  ;;  %v288_v54 = vld [vmem:[#allocation8 + $0x1d8] sm:$0xff]  ;;  %v3103_v5 = vmov 0.0   ;;  %v589_v25 = vld [vmem:[#allocation9 + $0x60] sm:$0xff] }
  0x68   :  { %v283_v50 = vld [vmem:[#allocation8 + $0x1b0] sm:$0xff]  ;;  %v292_v59 = vld [vmem:[#allocation8 + $0x1f8] sm:$0xff]  ;;  %379 = vmatprep.mubr.f32.mxu1 %v3103_v5  ;;  %v594_v31 = vld [vmem:[#allocation9 + $0x88] sm:$0xff] }
  0x69   :  { %v2257_v51 = vpack.c.bf16 %v283_v50, %v279_v49  ;;  %v287_v60 = vld [vmem:[#allocation8 + $0x1d0] sm:$0xff]  ;;  %v2259_v62 = vpack.c.bf16 %v292_v59, %v288_v54  ;;  %v580_v2 = vld [vmem:[#allocation9 + $0x18] sm:$0xff]  ;;  %v598_v33 = vld [vmem:[#allocation9 + $0xa8] sm:$0xff] }
  0x6a   :  { %2198 = vmatpush3.bf16.msra.mxu0 %v2195_v56  ;;  %2226 = vmatpush1.bf16.msra.mxu1 %v2225_v15  ;;  %v285_v56 = vld [vmem:[#allocation8 + $0x1c0] sm:$0xff]  ;;  %v291_v61 = vld [vmem:[#allocation8 + $0x1f0] sm:$0xff]  ;;  %v584_v4 = vld [vmem:[#allocation9 + $0x38] sm:$0xff]  ;;  %v3241_v44 = vpack.c.bf16 %v598_v33, %v594_v31 }
  0x6b   :  { %2232 = vmatprep.subr.bf16.mxu0 %v2231_v1  ;;  %v2229_v58 = vpack.c.bf16 %v289_v57, %v285_v56  ;;  %2228 = vmatprep.subr.bf16.mxu1 %v2227_v55  ;;  %v2261_v63 = vpack.c.bf16 %v291_v61, %v287_v60  ;;  %v582_v1 = vld [vmem:[#allocation9 + $0x28] sm:$0xff]  ;;  %v3208_v6 = vpack.c.bf16 %v584_v4, %v580_v2  ;;  %v588_v17 = vld [vmem:[#allocation9 + $0x58] sm:$0xff]  ;;  %v593_v38 = vld [vmem:[#allocation9 + $0x80] sm:$0xff] }
  0x6c   :  { %v3205_v3 = vpack.c.bf16 %v582_v1, %v578_v0  ;;  %v597_v40 = vld [vmem:[#allocation9 + $0xa0] sm:$0xff]  ;;  %v599_v43 = vld [vmem:[#allocation9 + $0xb0] sm:$0xff]  ;;  %v606_v49 = vld [vmem:[#allocation9 + $0xe8] sm:$0xff] }
  0x6d   :  { %2156 = vmatmul.mubr.f32.vlgmr.msra.gmra.mrb[0].mxu0 %v86_v9  ;;  %v604_v50 = vld [vmem:[#allocation9 + $0xd8] sm:$0xff]  ;;  %v3247_v52 = vpack.c.bf16 %v597_v40, %v593_v38  ;;  %v601_v54 = vld [vmem:[#allocation9 + $0xc0] sm:$0xff]  ;;  %v603_v57 = vld [vmem:[#allocation9 + $0xd0] sm:$0xff] }
  0x6e   :  { %2158 = vmatprep.mubr.f32.mxu0 %v87_v11  ;;  %2234 = vmatpush1.bf16.msra.mxu0 %v2233_v10  ;;  %v581_v10 = vld [vmem:[#allocation9 + $0x20] sm:$0xff]  ;;  %v579_v11 = vld [vmem:[#allocation9 + $0x10] sm:$0xff]  ;;  %v614_v1 = vld [vmem:[#allocation9 + $0x128] sm:$0xff] }
  0x6f   :  { %2236 = vmatprep.subr.bf16.mxu0 %v2235_v12  ;;  %2230 = vmatpush1.bf16.msra.mxu1 %v2229_v58  ;;  %v583_v12 = vld [vmem:[#allocation9 + $0x30] sm:$0xff]  ;;  %v605_v56 = vld [vmem:[#allocation9 + $0xe0] sm:$0xff]  ;;  %v612_v2 = vld [vmem:[#allocation9 + $0x118] sm:$0xff] }
  0x70   :  { %2264 = vmatprep.subr.bf16.mxu1 %v3205_v3  ;;  %v607_v58 = vld [vmem:[#allocation9 + $0xf0] sm:$0xff]  ;;  %v616_v4 = vld [vmem:[#allocation9 + $0x138] sm:$0xff] }
  0x71   :  { %2159 = vmatmul.mubr.f32.gmra.mrb[2].mxu0 %v88_v18  ;;  %v592_v18 = vld [vmem:[#allocation9 + $0x78] sm:$0xff]  ;;  %v619_v31 = vld [vmem:[#allocation9 + $0x150] sm:$0xff] }
  0x72   :  { %2161 = vmatprep.mubr.f32.mxu0 %v89_v20  ;;  %2238 = vmatpush1.bf16.msra.mxu0 %v2237_v19  ;;  %v3219_v19 = vpack.c.bf16 %v581_v10, %v577_v8  ;;  %v3221_v20 = vpack.c.bf16 %v583_v12, %v579_v11  ;;  %v3226_v30 = vpack.c.bf16 %v592_v18, %v588_v17  ;;  %v609_v10 = vld [vmem:[#allocation9 + $0x100] sm:$0xff]  ;;  %v618_v17 = vld [vmem:[#allocation9 + $0x148] sm:$0xff]  ;;  %v628_v40 = vld [vmem:[#allocation9 + $0x198] sm:$0xff] }
  0x73   :  { %2240 = vmatprep.subr.bf16.mxu0 %v2239_v21  ;;  %v585_v21 = vld [vmem:[#allocation9 + $0x40] sm:$0xff]  ;;  %v3265_v8 = vpack.c.bf16 %v605_v56, %v601_v54 }
  0x74   :  { %v613_v12 = vld [vmem:[#allocation9 + $0x120] sm:$0xff] }
  0x75   :  { %2162 = vmatmul.mubr.f32.gmra.mrb[4].mxu0 %v90_v26  ;;  %v587_v26 = vld [vmem:[#allocation9 + $0x50] sm:$0xff] }
  0x76   :  { %2164 = vmatprep.mubr.f32.mxu0 %v91_v28  ;;  %2242 = vmatpush1.bf16.msra.mxu0 %v2241_v27  ;;  %v591_v27 = vld [vmem:[#allocation9 + $0x70] sm:$0xff] }
  0x77   :  { %2244 = vmatprep.subr.bf16.mxu0 %v2243_v29  ;;  %v3224_v29 = vpack.c.bf16 %v590_v16, %v586_v14  ;;  %v3233_v37 = vpack.c.bf16 %v591_v27, %v587_v26  ;;  %v615_v14 = vld [vmem:[#allocation9 + $0x130] sm:$0xff]  ;;  %v3275_v16 = vpack.c.bf16 %v616_v4, %v612_v2  ;;  %v617_v26 = vld [vmem:[#allocation9 + $0x140] sm:$0xff] }
  0x78   :  { %v637_v4 = vld [vmem:[#allocation9 + $0x1e0] sm:$0xff] }
  0x79   :  { %2165 = vmatmul.mubr.f32.gmra.mrb[6].mxu0 %v92_v34  ;;  %v596_v34 = vld [vmem:[#allocation9 + $0x98] sm:$0xff] }
  0x7a   :  { %2246 = vmatpush1.bf16.msra.mxu0 %v2245_v35  ;;  %492 = vmatprep.mubr.f32.mxu0 %v3103_v5  ;;  %v600_v35 = vld [vmem:[#allocation9 + $0xb8] sm:$0xff] }
  0x7b   :  { %2248 = vmatprep.subr.bf16.mxu0 %v2247_v36  ;;  %v3231_v36 = vpack.c.bf16 %v589_v25, %v585_v21  ;;  %v3243_v45 = vpack.c.bf16 %v600_v35, %v596_v34  ;;  %v622_v21 = vld [vmem:[#allocation9 + $0x168] sm:$0xff] }
  0x7c   :  { %v3289_v33 = vpack.c.bf16 %v622_v21, %v618_v17  ;;  %v626_v35 = vld [vmem:[#allocation9 + $0x188] sm:$0xff]  ;;  %v295_v17 = vlaneseq }
  0x7e   :  { %2250 = vmatpush1.bf16.msra.mxu0 %v2249_v41 }
  0x7f   :  { %2252 = vmatprep.subr.bf16.mxu0 %v2251_v42  ;;  %v595_v42 = vld [vmem:[#allocation9 + $0x90] sm:$0xff] }
  0x80   :  { %v3249_v53 = vpack.c.bf16 %v599_v43, %v595_v42 }
  0x82   :  { %2254 = vmatpush1.bf16.msra.mxu0 %v2253_v47  ;;  %v602_v47 = vld [vmem:[#allocation9 + $0xc8] sm:$0xff] }
  0x83   :  { %2256 = vmatprep.subr.bf16.mxu0 %v2255_v48  ;;  %v3258_v60 = vpack.c.bf16 %v606_v49, %v602_v47  ;;  %v627_v49 = vld [vmem:[#allocation9 + $0x190] sm:$0xff] }
  0x86   :  { %2258 = vmatpush1.bf16.msra.mxu0 %v2257_v51  ;;  %v608_v51 = vld [vmem:[#allocation9 + $0xf8] sm:$0xff] }
  0x87   :  { %2260 = vmatprep.subr.bf16.mxu0 %v2259_v62  ;;  %v3260_v61 = vpack.c.bf16 %v608_v51, %v604_v50  ;;  %v610_v62 = vld [vmem:[#allocation9 + $0x108] sm:$0xff]  ;;  %v631_v50 = vld [vmem:[#allocation9 + $0x1b0] sm:$0xff] }
  0x8a   :  { %2262 = vmatpush1.bf16.msra.mxu0 %v2261_v63 }
  0x8b   :  { %2296 = vmatprep.subr.bf16.mxu0 %v3208_v6 }
 0x140   :  { %v2157_v9 = vpop.f32.mrb[0].mxu0 }
 0x141   :  { %v182_v13 = vpop.f32.mrb[1].mxu0  ;;  %v188_v22 = vadd.f32 %v2157_v9, %v3216_v7  ;;  %v3267_v9 = vpack.c.bf16 %v607_v58, %v603_v57  ;;  %v638_v57 = vld [vmem:[#allocation9 + $0x1e8] sm:$0xff]  ;;  %v636_v58 = vld [vmem:[#allocation9 + $0x1d8] sm:$0xff] }
 0x142   :  { %v183_v15 = vadd.f32 %v3216_v7, %v182_v13  ;;  %v611_v13 = vld [vmem:[#allocation9 + $0x110] sm:$0xff] }
 0x143   :  { %v222_v39 = vmax.f32 %v188_v22, 0.0  ;;  %v620_v22 = vld [vmem:[#allocation9 + $0x158] sm:$0xff]  ;;  %v3281_v25 = vpack.c.bf16 %v615_v14, %v611_v13 }
 0x144   :  { %v221_v23 = vmax.f32 %v183_v15, 0.0  ;;  %v2160_v24 = vpop.f32.mrb[2].mxu0  ;;  %v3273_v15 = vpack.c.bf16 %v614_v1, %v610_v62  ;;  %v640_v62 = vld [vmem:[#allocation9 + $0x1f8] sm:$0xff]  ;;  %v633_v1 = vld [vmem:[#allocation9 + $0x1c0] sm:$0xff] }
 0x145   :  { %v192_v28 = vpop.f32.mrb[3].mxu0  ;;  %v198_v55 = vadd.f32 %v2160_v24, %v3216_v7  ;;  %v3279_v24 = vpack.c.bf16 %v613_v12, %v609_v10  ;;  %v635_v10 = vld [vmem:[#allocation9 + $0x1d0] sm:$0xff]  ;;  %v3322_v13 = vpack.c.bf16 %v640_v62, %v636_v58 }
 0x146   :  { %380 = vmatmul.mubr.f32.vlgmr.msra.gmra.mrb[0].mxu1 %v221_v23  ;;  %493 = vmatmul.mubr.f32.vlgmr.msra.gmra.mrb[8].mxu0 %v221_v23  ;;  %v193_v32 = vadd.f32 %v3216_v7, %v192_v28  ;;  %v624_v23 = vld [vmem:[#allocation9 + $0x178] sm:$0xff]  ;;  %v621_v28 = vld [vmem:[#allocation9 + $0x160] sm:$0xff] }
 0x147   :  { %2266 = vmatpush1.bf16.msra.mxu1 %v3219_v19  ;;  %2298 = vmatpush1.bf16.msra.mxu0 %v3221_v20  ;;  %v224_v11 = vmax.f32 %v198_v55, 0.0  ;;  %v3291_v34 = vpack.c.bf16 %v624_v23, %v620_v22  ;;  %v3296_v42 = vpack.c.bf16 %v621_v28, %v617_v26  ;;  %v634_v55 = vld [vmem:[#allocation9 + $0x1c8] sm:$0xff]  ;;  %v293_v22 = vld [vmem:[%s3668_s5] sm:$0xf] }
 0x148   :  { %385 = vmatprep.mubr.f32.mxu1 %v3103_v5  ;;  %498 = vmatprep.mubr.f32.mxu0 %v3103_v5  ;;  %v3237_v41 = vpop.f32.mrb[4].mxu0  ;;  %v223_v48 = vmax.f32 %v193_v32, 0.0  ;;  %v623_v32 = vld [vmem:[#allocation9 + $0x170] sm:$0xff]  ;;  %v3320_v12 = vpack.c.bf16 %v638_v57, %v634_v55 }
 0x149   :  { %2268 = vmatprep.subr.bf16.mxu1 %v3224_v29  ;;  %2300 = vmatprep.subr.bf16.mxu0 %v3226_v30  ;;  %v202_v46 = vpop.f32.mrb[5].mxu0  ;;  %v208_v27 = vadd.f32 %v3237_v41, %v3216_v7  ;;  %v632_v41 = vld [vmem:[#allocation9 + $0x1b8] sm:$0xff]  ;;  %v3298_v43 = vpack.c.bf16 %v623_v32, %v619_v31 }
 0x14a   :  { %386 = vmatmul.mubr.f32.gmra.mrb[2].mxu1 %v222_v39  ;;  %499 = vmatmul.mubr.f32.gmra.mrb[10].mxu0 %v222_v39  ;;  %v203_v0 = vadd.f32 %v3216_v7, %v202_v46  ;;  %v630_v39 = vld [vmem:[#allocation9 + $0x1a8] sm:$0xff]  ;;  %v625_v46 = vld [vmem:[#allocation9 + $0x180] sm:$0xff]  ;;  %v3306_v54 = vpack.c.bf16 %v632_v41, %v628_v40 }
 0x14b   :  { %2270 = vmatpush1.bf16.msra.mxu1 %v3231_v36  ;;  %2302 = vmatpush1.bf16.msra.mxu0 %v3233_v37  ;;  %v226_v47 = vmax.f32 %v208_v27, 0.0  ;;  %v3304_v51 = vpack.c.bf16 %v630_v39, %v626_v35 }
 0x14c   :  { %391 = vmatprep.mubr.f32.mxu1 %v3103_v5  ;;  %504 = vmatprep.mubr.f32.mxu0 %v3103_v5  ;;  %v3254_v59 = vpop.f32.mrb[6].mxu0  ;;  %v225_v18 = vmax.f32 %v203_v0, 0.0  ;;  %v3312_v0 = vpack.c.bf16 %v631_v50, %v627_v49 }
 0x14d   :  { %2272 = vmatprep.subr.bf16.mxu1 %v3241_v44  ;;  %2304 = vmatprep.subr.bf16.mxu0 %v3243_v45  ;;  %v212_v63 = vpop.f32.mrb[7].mxu0  ;;  %v218_v2 = vadd.f32 %v3254_v59, %v3216_v7 }
 0x14e   :  { %392 = vmatmul.mubr.f32.gmra.mrb[4].mxu1 %v223_v48  ;;  %505 = vmatmul.mubr.f32.gmra.mrb[12].mxu0 %v223_v48  ;;  %v213_v38 = vadd.f32 %v3216_v7, %v212_v63  ;;  %v629_v48 = vld [vmem:[#allocation9 + $0x1a0] sm:$0xff]  ;;  %v3326_v7 = vpack.c.bf16 %v637_v4, %v633_v1 }
 0x14f   :  { %2274 = vmatpush1.bf16.msra.mxu1 %v3247_v52  ;;  %2306 = vmatpush1.bf16.msra.mxu0 %v3249_v53  ;;  %v3310_v63 = vpack.c.bf16 %v629_v48, %v625_v46  ;;  %v228_v14 = vmax.f32 %v218_v2, 0.0 }
 0x150   :  { %397 = vmatprep.mubr.f32.mxu1 %v3103_v5  ;;  %510 = vmatprep.mubr.f32.mxu0 %v3103_v5  ;;  %v227_v56 = vmax.f32 %v213_v38, 0.0 }
 0x151   :  { %2276 = vmatprep.subr.bf16.mxu1 %v3258_v60  ;;  %2308 = vmatprep.subr.bf16.mxu0 %v3260_v61 }
 0x152   :  { %398 = vmatmul.mubr.f32.gmra.mrb[6].mxu1 %v224_v11  ;;  %511 = vmatmul.mubr.f32.gmra.mrb[14].mxu0 %v224_v11  ;;  %v639_v11 = vld [vmem:[#allocation9 + $0x1f0] sm:$0xff] }
 0x153   :  { %2278 = vmatpush1.bf16.msra.mxu1 %v3265_v8  ;;  %2310 = vmatpush1.bf16.msra.mxu0 %v3267_v9  ;;  %v3328_v59 = vpack.c.bf16 %v639_v11, %v635_v10 }
 0x154   :  { %403 = vmatprep.mubr.f32.mxu1 %v3103_v5  ;;  %516 = vmatprep.mubr.f32.mxu0 %v3103_v5 }
 0x155   :  { %2280 = vmatprep.subr.bf16.mxu1 %v3273_v15  ;;  %2312 = vmatprep.subr.bf16.mxu0 %v3275_v16 }
 0x156   :  { %404 = vmatmul.mubr.f32.gmra.mrb[8].mxu1 %v225_v18  ;;  %517 = vmatmul.mubr.f32.gmra.mrb[16].mxu0 %v225_v18  ;;  %v296_v18 = vshrl.u32 %v295_v17, 7 }
 0x157   :  { %2282 = vmatpush1.bf16.msra.mxu1 %v3279_v24  ;;  %2314 = vmatpush1.bf16.msra.mxu0 %v3281_v25 }
 0x158   :  { %409 = vmatprep.mubr.f32.mxu1 %v3103_v5  ;;  %522 = vmatprep.mubr.f32.mxu0 %v3103_v5  ;;  %v297_v21 = vsub.s32 0, %v296_v18  ;;  %v301_v23 = vsub.s32 1, %v296_v18  ;;  %v309_v32 = vsub.s32 3, %v296_v18  ;;  %v305_v48 = vsub.s32 2, %v296_v18 }
 0x159   :  { %2284 = vmatprep.subr.bf16.mxu1 %v3289_v33  ;;  %2316 = vmatprep.subr.bf16.mxu0 %v3291_v34 }
 0x15a   :  { %410 = vmatmul.mubr.f32.gmra.mrb[10].mxu1 %v226_v47  ;;  %523 = vmatmul.mubr.f32.gmra.mrb[18].mxu0 %v226_v47  ;;  %v3379_v26 = vrot.slane %v293_v22, %v297_v21  ;;  %v3381_v27 = vrot.slane %v293_v22, %v301_v23  ;;  %v3385_v47 = vrot.slane %v293_v22, %v309_v32 }
 0x15b   :  { %2286 = vmatpush1.bf16.msra.mxu1 %v3296_v42  ;;  %2318 = vmatpush1.bf16.msra.mxu0 %v3298_v43  ;;  %v3388_v50 = vrot.slane %v293_v22, %v305_v48 }
 0x15c   :  { %415 = vmatprep.mubr.f32.mxu1 %v3103_v5  ;;  %528 = vmatprep.mubr.f32.mxu0 %v3103_v5 }
 0x15d   :  { %2288 = vmatprep.subr.bf16.mxu1 %v3304_v51  ;;  %2320 = vmatprep.subr.bf16.mxu0 %v3306_v54 }
 0x15e   :  { %416 = vmatmul.mubr.f32.gmra.mrb[12].mxu1 %v227_v56  ;;  %529 = vmatmul.mubr.f32.gmra.mrb[20].mxu0 %v227_v56 }
 0x15f   :  { %2290 = vmatpush1.bf16.msra.mxu1 %v3310_v63  ;;  %2322 = vmatpush1.bf16.msra.mxu0 %v3312_v0 }
 0x160   :  { %421 = vmatprep.mubr.f32.mxu1 %v3103_v5  ;;  %534 = vmatprep.mubr.f32.mxu0 %v3103_v5 }
 0x161   :  { %2292 = vmatprep.subr.bf16.mxu1 %v3320_v12  ;;  %2324 = vmatprep.subr.bf16.mxu0 %v3322_v13 }
 0x162   :  { %422 = vmatmul.mubr.f32.gmra.mrb[14].mxu1 %v228_v14  ;;  %535 = vmatmul.mubr.f32.gmra.mrb[22].mxu0 %v228_v14 }
 0x163   :  { %2294 = vmatpush1.bf16.msra.mxu1 %v3326_v7  ;;  %2326 = vmatpush1.bf16.msra.mxu0 %v3328_v59 }
 0x164   :  { %705 = vmatprep.mubr.f32.mxu1 %v3103_v5  ;;  %776 = vmatprep.mubr.f32.mxu0 %v3103_v5 }
 0x165   :  { %2328 = vmatprep.subr.bf16.mxu1 %v3205_v3  ;;  %2360 = vmatprep.subr.bf16.mxu0 %v3208_v6 }
 0x166   :  { %706 = vmatmul.mubr.f32.vlgmr.msra.gmra.mrb[0].mxu1 %v3103_v5  ;;  %777 = vmatmul.mubr.f32.vlgmr.msra.gmra.mrb[8].mxu0 %v3103_v5 }
 0x167   :  { %2330 = vmatpush1.bf16.msra.mxu1 %v3219_v19  ;;  %2362 = vmatpush1.bf16.msra.mxu0 %v3221_v20 }
 0x168   :  { %2332 = vmatprep.subr.bf16.mxu1 %v3224_v29  ;;  %2364 = vmatprep.subr.bf16.mxu0 %v3226_v30 }
 0x169   :  { %880 = vmatprep.mubr.f32.mxu1 %v3103_v5  ;;  %951 = vmatprep.mubr.f32.mxu0 %v3103_v5 }
 0x16b   :  { %2334 = vmatpush1.bf16.msra.mxu1 %v3231_v36  ;;  %2366 = vmatpush1.bf16.msra.mxu0 %v3233_v37 }
 0x16c   :  { %2336 = vmatprep.subr.bf16.mxu1 %v3241_v44  ;;  %2368 = vmatprep.subr.bf16.mxu0 %v3243_v45 }
 0x16f   :  { %2338 = vmatpush1.bf16.msra.mxu1 %v3247_v52  ;;  %2370 = vmatpush1.bf16.msra.mxu0 %v3249_v53 }
 0x170   :  { %2340 = vmatprep.subr.bf16.mxu1 %v3258_v60  ;;  %2372 = vmatprep.subr.bf16.mxu0 %v3260_v61 }
 0x173   :  { %2342 = vmatpush1.bf16.msra.mxu1 %v3265_v8  ;;  %2374 = vmatpush1.bf16.msra.mxu0 %v3267_v9 }
 0x174   :  { %2344 = vmatprep.subr.bf16.mxu1 %v3273_v15  ;;  %2376 = vmatprep.subr.bf16.mxu0 %v3275_v16 }
 0x177   :  { %2346 = vmatpush1.bf16.msra.mxu1 %v3279_v24  ;;  %2378 = vmatpush1.bf16.msra.mxu0 %v3281_v25 }
 0x178   :  { %2348 = vmatprep.subr.bf16.mxu1 %v3289_v33  ;;  %2380 = vmatprep.subr.bf16.mxu0 %v3291_v34 }
 0x17b   :  { %2350 = vmatpush1.bf16.msra.mxu1 %v3296_v42  ;;  %2382 = vmatpush1.bf16.msra.mxu0 %v3298_v43 }
 0x17c   :  { %2352 = vmatprep.subr.bf16.mxu1 %v3304_v51  ;;  %2384 = vmatprep.subr.bf16.mxu0 %v3306_v54 }
 0x17f   :  { %2354 = vmatpush1.bf16.msra.mxu1 %v3310_v63  ;;  %2386 = vmatpush1.bf16.msra.mxu0 %v3312_v0 }
 0x180   :  { %2356 = vmatprep.subr.bf16.mxu1 %v3320_v12  ;;  %2388 = vmatprep.subr.bf16.mxu0 %v3322_v13 }
 0x183   :  { %2358 = vmatpush1.bf16.msra.mxu1 %v3326_v7  ;;  %2390 = vmatpush1.bf16.msra.mxu0 %v3328_v59 }
 0x184   :  { %2392 = vmatprep.subr.bf16.mxu1 %v3205_v3  ;;  %2424 = vmatprep.subr.bf16.mxu0 %v3208_v6 }
 0x239   :  { %v707_v28 = vpop.f32.mrb[0].mxu1  ;;  %v778_v31 = vpop.f32.mrb[8].mxu0 }
 0x23a   :  { %v2775_v35 = vadd.f32 %v707_v28, %v3379_v26  ;;  %v709_v38 = vpop.f32.mrb[1].mxu1  ;;  %v780_v39 = vpop.f32.mrb[9].mxu0  ;;  %v2791_v56 = vadd.f32 %v778_v31, %v3388_v50 }
 0x23b   :  { %v2776_v40 = vadd.f32 %v709_v38, %v3381_v27  ;;  %v2792_v49 = vadd.f32 %v780_v39, %v3385_v47 }
 0x23c   :  { %v2073_v41 = vmul.f32 -1.442695, %v2775_v35 }
 0x23d   :  { %v2074_v46 = vmul.f32 -1.442695, %v2776_v40  ;;  %v2075_v55 = vmul.f32 -1.442695, %v2792_v49 }
 0x23e   :  { %2849 = vpow2.f32 %v2073_v41 }
 0x23f   :  { %2851 = vpow2.f32 %v2074_v46 }
 0x240   :  { %2853 = vpow2.f32 %v2075_v55 }
 0x241   :  { %2855 = vtanh.f32 %v2791_v56 }
 0x248   :  { %v2850_v57 = vpop.eup %2849 }
 0x249   :  { %v2852_v58 = vpop.eup %2851  ;;  %v790_v62 = vadd.f32 1.0, %v2850_v57 }
 0x24a   :  { %v796_v1 = vadd.f32 1.0, %v2852_v58  ;;  %v2854_v2 = vpop.eup %2853 }
 0x24b   :  { %2857 = vrcp.f32 %v790_v62  ;;  %v2856_v4 = vpop.eup %2855  ;;  %v803_v17 = vadd.f32 1.0, %v2854_v2 }
 0x24c   :  { %2859 = vrcp.f32 %v796_v1 }
 0x24d   :  { %2861 = vrcp.f32 %v803_v17 }
 0x255   :  { %v2858_v10 = vpop.eup %2857 }
 0x256   :  { %v2860_v11 = vpop.eup %2859  ;;  %v807_v14 = vmul.f32 %v2858_v10, %v2856_v4 }
 0x257   :  { %v806_v18 = vmul.f32 0.0, %v2860_v11  ;;  %v2862_v22 = vpop.eup %2861 }
 0x259   :  { %v3391_v21 = vadd.f32 %v807_v14, %v806_v18 }
 0x25b   :  { %2863 = vtanh.f32 %v3391_v21 }
 0x265   :  { %v2864_v23 = vpop.eup %2863 }
 0x266   :  { %v810_v28 = vmul.f32 %v2864_v23, %v2862_v22 }
 0x268   :  { %881 = vmatmul.mubr.f32.vlgmr.msra.gmra.mrb[2].mxu1 %v810_v28  ;;  %952 = vmatmul.mubr.f32.vlgmr.msra.gmra.mrb[10].mxu0 %v810_v28 }
 0x269   :  { %2394 = vmatpush1.bf16.msra.mxu1 %v3219_v19  ;;  %2426 = vmatpush1.bf16.msra.mxu0 %v3221_v20 }
 0x26a   :  { %2396 = vmatprep.subr.bf16.mxu1 %v3224_v29  ;;  %2428 = vmatprep.subr.bf16.mxu0 %v3226_v30 }
 0x26b   :  { %1055 = vmatprep.mubr.f32.mxu1 %v3103_v5  ;;  %1126 = vmatprep.mubr.f32.mxu0 %v3103_v5 }
 0x26d   :  { %2398 = vmatpush1.bf16.msra.mxu1 %v3231_v36  ;;  %2430 = vmatpush1.bf16.msra.mxu0 %v3233_v37 }
 0x26e   :  { %2400 = vmatprep.subr.bf16.mxu1 %v3241_v44  ;;  %2432 = vmatprep.subr.bf16.mxu0 %v3243_v45 }
 0x271   :  { %2402 = vmatpush1.bf16.msra.mxu1 %v3247_v52  ;;  %2434 = vmatpush1.bf16.msra.mxu0 %v3249_v53 }
 0x272   :  { %2404 = vmatprep.subr.bf16.mxu1 %v3258_v60  ;;  %2436 = vmatprep.subr.bf16.mxu0 %v3260_v61 }
 0x275   :  { %2406 = vmatpush1.bf16.msra.mxu1 %v3265_v8  ;;  %2438 = vmatpush1.bf16.msra.mxu0 %v3267_v9 }
 0x276   :  { %2408 = vmatprep.subr.bf16.mxu1 %v3273_v15  ;;  %2440 = vmatprep.subr.bf16.mxu0 %v3275_v16 }
 0x279   :  { %2410 = vmatpush1.bf16.msra.mxu1 %v3279_v24  ;;  %2442 = vmatpush1.bf16.msra.mxu0 %v3281_v25 }
 0x27a   :  { %2412 = vmatprep.subr.bf16.mxu1 %v3289_v33  ;;  %2444 = vmatprep.subr.bf16.mxu0 %v3291_v34 }
 0x27d   :  { %2414 = vmatpush1.bf16.msra.mxu1 %v3296_v42  ;;  %2446 = vmatpush1.bf16.msra.mxu0 %v3298_v43 }
 0x27e   :  { %2416 = vmatprep.subr.bf16.mxu1 %v3304_v51  ;;  %2448 = vmatprep.subr.bf16.mxu0 %v3306_v54 }
 0x281   :  { %2418 = vmatpush1.bf16.msra.mxu1 %v3310_v63  ;;  %2450 = vmatpush1.bf16.msra.mxu0 %v3312_v0 }
 0x282   :  { %2420 = vmatprep.subr.bf16.mxu1 %v3320_v12  ;;  %2452 = vmatprep.subr.bf16.mxu0 %v3322_v13 }
 0x285   :  { %2422 = vmatpush1.bf16.msra.mxu1 %v3326_v7  ;;  %2454 = vmatpush1.bf16.msra.mxu0 %v3328_v59 }
 0x286   :  { %2456 = vmatprep.subr.bf16.mxu1 %v3205_v3  ;;  %2488 = vmatprep.subr.bf16.mxu0 %v3208_v6 }
 0x33b   :  { %v882_v31 = vpop.f32.mrb[2].mxu1  ;;  %v953_v32 = vpop.f32.mrb[10].mxu0 }
 0x33c   :  { %v2777_v35 = vadd.f32 %v882_v31, %v3379_v26  ;;  %v884_v38 = vpop.f32.mrb[3].mxu1  ;;  %v955_v39 = vpop.f32.mrb[11].mxu0  ;;  %v2793_v55 = vadd.f32 %v953_v32, %v3388_v50 }
 0x33d   :  { %v2778_v40 = vadd.f32 %v884_v38, %v3381_v27  ;;  %v2794_v48 = vadd.f32 %v955_v39, %v3385_v47 }
 0x33e   :  { %v2076_v41 = vmul.f32 -1.442695, %v2777_v35 }
 0x33f   :  { %v2077_v46 = vmul.f32 -1.442695, %v2778_v40  ;;  %v2078_v49 = vmul.f32 -1.442695, %v2794_v48 }
 0x340   :  { %2865 = vpow2.f32 %v2076_v41 }
 0x341   :  { %2867 = vpow2.f32 %v2077_v46 }
 0x342   :  { %2869 = vpow2.f32 %v2078_v49 }
 0x343   :  { %2871 = vtanh.f32 %v2793_v55 }
 0x34a   :  { %v2866_v56 = vpop.eup %2865 }
 0x34b   :  { %v2868_v57 = vpop.eup %2867  ;;  %v965_v58 = vadd.f32 1.0, %v2866_v56 }
 0x34c   :  { %v971_v62 = vadd.f32 1.0, %v2868_v57  ;;  %v2870_v1 = vpop.eup %2869 }
 0x34d   :  { %2873 = vrcp.f32 %v965_v58  ;;  %v2872_v2 = vpop.eup %2871  ;;  %v978_v14 = vadd.f32 1.0, %v2870_v1 }
 0x34e   :  { %2875 = vrcp.f32 %v971_v62 }
 0x34f   :  { %2877 = vrcp.f32 %v978_v14 }
 0x357   :  { %v2874_v4 = vpop.eup %2873 }
 0x358   :  { %v2876_v10 = vpop.eup %2875  ;;  %v982_v11 = vmul.f32 %v2874_v4, %v2872_v2 }
 0x359   :  { %v981_v17 = vmul.f32 %v2876_v10, %v3391_v21  ;;  %v2878_v22 = vpop.eup %2877 }
 0x35b   :  { %v3433_v18 = vadd.f32 %v982_v11, %v981_v17 }
 0x35d   :  { %2879 = vtanh.f32 %v3433_v18 }
 0x367   :  { %v2880_v23 = vpop.eup %2879 }
 0x368   :  { %v985_v28 = vmul.f32 %v2880_v23, %v2878_v22 }
 0x36a   :  { %1056 = vmatmul.mubr.f32.vlgmr.msra.gmra.mrb[4].mxu1 %v985_v28  ;;  %1127 = vmatmul.mubr.f32.vlgmr.msra.gmra.mrb[12].mxu0 %v985_v28 }
 0x36b   :  { %2458 = vmatpush1.bf16.msra.mxu1 %v3219_v19  ;;  %2490 = vmatpush1.bf16.msra.mxu0 %v3221_v20 }
 0x36c   :  { %2460 = vmatprep.subr.bf16.mxu1 %v3224_v29  ;;  %2492 = vmatprep.subr.bf16.mxu0 %v3226_v30 }
 0x36d   :  { %1230 = vmatprep.mubr.f32.mxu1 %v3103_v5  ;;  %1301 = vmatprep.mubr.f32.mxu0 %v3103_v5 }
 0x36f   :  { %2462 = vmatpush1.bf16.msra.mxu1 %v3231_v36  ;;  %2494 = vmatpush1.bf16.msra.mxu0 %v3233_v37 }
 0x370   :  { %2464 = vmatprep.subr.bf16.mxu1 %v3241_v44  ;;  %2496 = vmatprep.subr.bf16.mxu0 %v3243_v45 }
 0x373   :  { %2466 = vmatpush1.bf16.msra.mxu1 %v3247_v52  ;;  %2498 = vmatpush1.bf16.msra.mxu0 %v3249_v53 }
 0x374   :  { %2468 = vmatprep.subr.bf16.mxu1 %v3258_v60  ;;  %2500 = vmatprep.subr.bf16.mxu0 %v3260_v61 }
 0x377   :  { %2470 = vmatpush1.bf16.msra.mxu1 %v3265_v8  ;;  %2502 = vmatpush1.bf16.msra.mxu0 %v3267_v9 }
 0x378   :  { %2472 = vmatprep.subr.bf16.mxu1 %v3273_v15  ;;  %2504 = vmatprep.subr.bf16.mxu0 %v3275_v16 }
 0x37b   :  { %2474 = vmatpush1.bf16.msra.mxu1 %v3279_v24  ;;  %2506 = vmatpush1.bf16.msra.mxu0 %v3281_v25 }
 0x37c   :  { %2476 = vmatprep.subr.bf16.mxu1 %v3289_v33  ;;  %2508 = vmatprep.subr.bf16.mxu0 %v3291_v34 }
 0x37f   :  { %2478 = vmatpush1.bf16.msra.mxu1 %v3296_v42  ;;  %2510 = vmatpush1.bf16.msra.mxu0 %v3298_v43 }
 0x380   :  { %2480 = vmatprep.subr.bf16.mxu1 %v3304_v51  ;;  %2512 = vmatprep.subr.bf16.mxu0 %v3306_v54 }
 0x383   :  { %2482 = vmatpush1.bf16.msra.mxu1 %v3310_v63  ;;  %2514 = vmatpush1.bf16.msra.mxu0 %v3312_v0 }
 0x384   :  { %2484 = vmatprep.subr.bf16.mxu1 %v3320_v12  ;;  %2516 = vmatprep.subr.bf16.mxu0 %v3322_v13 }
 0x387   :  { %2486 = vmatpush1.bf16.msra.mxu1 %v3326_v7  ;;  %2518 = vmatpush1.bf16.msra.mxu0 %v3328_v59 }
 0x388   :  { %2520 = vmatprep.subr.bf16.mxu1 %v3205_v3  ;;  %2552 = vmatprep.subr.bf16.mxu0 %v3208_v6 }
 0x43d   :  { %v1057_v21 = vpop.f32.mrb[4].mxu1  ;;  %v1128_v31 = vpop.f32.mrb[12].mxu0 }
 0x43e   :  { %v2779_v32 = vadd.f32 %v1057_v21, %v3379_v26  ;;  %v1059_v35 = vpop.f32.mrb[5].mxu1  ;;  %v1130_v38 = vpop.f32.mrb[13].mxu0  ;;  %v2795_v49 = vadd.f32 %v1128_v31, %v3388_v50 }
 0x43f   :  { %v2780_v39 = vadd.f32 %v1059_v35, %v3381_v27  ;;  %v2796_v46 = vadd.f32 %v1130_v38, %v3385_v47 }
 0x440   :  { %v2079_v40 = vmul.f32 -1.442695, %v2779_v32 }
 0x441   :  { %v2080_v41 = vmul.f32 -1.442695, %v2780_v39  ;;  %v2081_v48 = vmul.f32 -1.442695, %v2796_v46 }
 0x442   :  { %2881 = vpow2.f32 %v2079_v40 }
 0x443   :  { %2883 = vpow2.f32 %v2080_v41 }
 0x444   :  { %2885 = vpow2.f32 %v2081_v48 }
 0x445   :  { %2887 = vtanh.f32 %v2795_v49 }
 0x44c   :  { %v2882_v55 = vpop.eup %2881 }
 0x44d   :  { %v2884_v56 = vpop.eup %2883  ;;  %v1140_v57 = vadd.f32 1.0, %v2882_v55 }
 0x44e   :  { %v1146_v58 = vadd.f32 1.0, %v2884_v56  ;;  %v2886_v62 = vpop.eup %2885 }
 0x44f   :  { %2889 = vrcp.f32 %v1140_v57  ;;  %v2888_v1 = vpop.eup %2887  ;;  %v1153_v11 = vadd.f32 1.0, %v2886_v62 }
 0x450   :  { %2891 = vrcp.f32 %v1146_v58 }
 0x451   :  { %2893 = vrcp.f32 %v1153_v11 }
 0x459   :  { %v2890_v2 = vpop.eup %2889 }
 0x45a   :  { %v2892_v4 = vpop.eup %2891  ;;  %v1157_v10 = vmul.f32 %v2890_v2, %v2888_v1 }
 0x45b   :  { %v1156_v14 = vmul.f32 %v2892_v4, %v3433_v18  ;;  %v2894_v22 = vpop.eup %2893 }
 0x45d   :  { %v3475_v17 = vadd.f32 %v1157_v10, %v1156_v14 }
 0x45f   :  { %2895 = vtanh.f32 %v3475_v17 }
 0x469   :  { %v2896_v23 = vpop.eup %2895 }
 0x46a   :  { %v1160_v28 = vmul.f32 %v2896_v23, %v2894_v22 }
 0x46c   :  { %1231 = vmatmul.mubr.f32.vlgmr.msra.gmra.mrb[6].mxu1 %v1160_v28  ;;  %1302 = vmatmul.mubr.f32.vlgmr.msra.gmra.mrb[14].mxu0 %v1160_v28 }
 0x46d   :  { %2522 = vmatpush1.bf16.msra.mxu1 %v3219_v19  ;;  %2554 = vmatpush1.bf16.msra.mxu0 %v3221_v20 }
 0x46e   :  { %2524 = vmatprep.subr.bf16.mxu1 %v3224_v29  ;;  %2556 = vmatprep.subr.bf16.mxu0 %v3226_v30 }
 0x46f   :  { %1405 = vmatprep.mubr.f32.mxu1 %v3103_v5  ;;  %1476 = vmatprep.mubr.f32.mxu0 %v3103_v5 }
 0x471   :  { %2526 = vmatpush1.bf16.msra.mxu1 %v3231_v36  ;;  %2558 = vmatpush1.bf16.msra.mxu0 %v3233_v37 }
 0x472   :  { %2528 = vmatprep.subr.bf16.mxu1 %v3241_v44  ;;  %2560 = vmatprep.subr.bf16.mxu0 %v3243_v45 }
 0x475   :  { %2530 = vmatpush1.bf16.msra.mxu1 %v3247_v52  ;;  %2562 = vmatpush1.bf16.msra.mxu0 %v3249_v53 }
 0x476   :  { %2532 = vmatprep.subr.bf16.mxu1 %v3258_v60  ;;  %2564 = vmatprep.subr.bf16.mxu0 %v3260_v61 }
 0x479   :  { %2534 = vmatpush1.bf16.msra.mxu1 %v3265_v8  ;;  %2566 = vmatpush1.bf16.msra.mxu0 %v3267_v9 }
 0x47a   :  { %2536 = vmatprep.subr.bf16.mxu1 %v3273_v15  ;;  %2568 = vmatprep.subr.bf16.mxu0 %v3275_v16 }
 0x47d   :  { %2538 = vmatpush1.bf16.msra.mxu1 %v3279_v24  ;;  %2570 = vmatpush1.bf16.msra.mxu0 %v3281_v25 }
 0x47e   :  { %2540 = vmatprep.subr.bf16.mxu1 %v3289_v33  ;;  %2572 = vmatprep.subr.bf16.mxu0 %v3291_v34 }
 0x481   :  { %2542 = vmatpush1.bf16.msra.mxu1 %v3296_v42  ;;  %2574 = vmatpush1.bf16.msra.mxu0 %v3298_v43 }
 0x482   :  { %2544 = vmatprep.subr.bf16.mxu1 %v3304_v51  ;;  %2576 = vmatprep.subr.bf16.mxu0 %v3306_v54 }
 0x485   :  { %2546 = vmatpush1.bf16.msra.mxu1 %v3310_v63  ;;  %2578 = vmatpush1.bf16.msra.mxu0 %v3312_v0 }
 0x486   :  { %2548 = vmatprep.subr.bf16.mxu1 %v3320_v12  ;;  %2580 = vmatprep.subr.bf16.mxu0 %v3322_v13 }
 0x489   :  { %2550 = vmatpush1.bf16.msra.mxu1 %v3326_v7  ;;  %2582 = vmatpush1.bf16.msra.mxu0 %v3328_v59 }
 0x48a   :  { %2584 = vmatprep.subr.bf16.mxu1 %v3205_v3  ;;  %2616 = vmatprep.subr.bf16.mxu0 %v3208_v6 }
 0x53f   :  { %v1232_v18 = vpop.f32.mrb[6].mxu1  ;;  %v1303_v21 = vpop.f32.mrb[14].mxu0 }
 0x540   :  { %v2781_v31 = vadd.f32 %v1232_v18, %v3379_v26  ;;  %v1234_v32 = vpop.f32.mrb[7].mxu1  ;;  %v1305_v35 = vpop.f32.mrb[15].mxu0  ;;  %v2797_v48 = vadd.f32 %v1303_v21, %v3388_v50 }
 0x541   :  { %v2782_v38 = vadd.f32 %v1234_v32, %v3381_v27  ;;  %v2798_v41 = vadd.f32 %v1305_v35, %v3385_v47 }
 0x542   :  { %v2082_v39 = vmul.f32 -1.442695, %v2781_v31 }
 0x543   :  { %v2083_v40 = vmul.f32 -1.442695, %v2782_v38  ;;  %v2084_v46 = vmul.f32 -1.442695, %v2798_v41 }
 0x544   :  { %2897 = vpow2.f32 %v2082_v39 }
 0x545   :  { %2899 = vpow2.f32 %v2083_v40 }
 0x546   :  { %2901 = vpow2.f32 %v2084_v46 }
 0x547   :  { %2903 = vtanh.f32 %v2797_v48 }
 0x54e   :  { %v2898_v49 = vpop.eup %2897 }
 0x54f   :  { %v2900_v55 = vpop.eup %2899  ;;  %v1315_v56 = vadd.f32 1.0, %v2898_v49 }
 0x550   :  { %v1321_v57 = vadd.f32 1.0, %v2900_v55  ;;  %v2902_v58 = vpop.eup %2901 }
 0x551   :  { %2905 = vrcp.f32 %v1315_v56  ;;  %v2904_v62 = vpop.eup %2903  ;;  %v1328_v10 = vadd.f32 1.0, %v2902_v58 }
 0x552   :  { %2907 = vrcp.f32 %v1321_v57 }
 0x553   :  { %2909 = vrcp.f32 %v1328_v10 }
 0x55b   :  { %v2906_v1 = vpop.eup %2905 }
 0x55c   :  { %v2908_v2 = vpop.eup %2907  ;;  %v1332_v4 = vmul.f32 %v2906_v1, %v2904_v62 }
 0x55d   :  { %v1331_v11 = vmul.f32 %v2908_v2, %v3475_v17  ;;  %v2910_v22 = vpop.eup %2909 }
 0x55f   :  { %v3517_v14 = vadd.f32 %v1332_v4, %v1331_v11 }
 0x561   :  { %2911 = vtanh.f32 %v3517_v14 }
 0x56b   :  { %v2912_v23 = vpop.eup %2911 }
 0x56c   :  { %v1335_v28 = vmul.f32 %v2912_v23, %v2910_v22 }
 0x56e   :  { %1406 = vmatmul.mubr.f32.vlgmr.msra.gmra.mrb[8].mxu1 %v1335_v28  ;;  %1477 = vmatmul.mubr.f32.vlgmr.msra.gmra.mrb[16].mxu0 %v1335_v28 }
 0x56f   :  { %2586 = vmatpush1.bf16.msra.mxu1 %v3219_v19  ;;  %2618 = vmatpush1.bf16.msra.mxu0 %v3221_v20 }
 0x570   :  { %2588 = vmatprep.subr.bf16.mxu1 %v3224_v29  ;;  %2620 = vmatprep.subr.bf16.mxu0 %v3226_v30 }
 0x571   :  { %1580 = vmatprep.mubr.f32.mxu1 %v3103_v5  ;;  %1651 = vmatprep.mubr.f32.mxu0 %v3103_v5 }
 0x573   :  { %2590 = vmatpush1.bf16.msra.mxu1 %v3231_v36  ;;  %2622 = vmatpush1.bf16.msra.mxu0 %v3233_v37 }
 0x574   :  { %2592 = vmatprep.subr.bf16.mxu1 %v3241_v44  ;;  %2624 = vmatprep.subr.bf16.mxu0 %v3243_v45 }
 0x577   :  { %2594 = vmatpush1.bf16.msra.mxu1 %v3247_v52  ;;  %2626 = vmatpush1.bf16.msra.mxu0 %v3249_v53 }
 0x578   :  { %2596 = vmatprep.subr.bf16.mxu1 %v3258_v60  ;;  %2628 = vmatprep.subr.bf16.mxu0 %v3260_v61 }
 0x57b   :  { %2598 = vmatpush1.bf16.msra.mxu1 %v3265_v8  ;;  %2630 = vmatpush1.bf16.msra.mxu0 %v3267_v9 }
 0x57c   :  { %2600 = vmatprep.subr.bf16.mxu1 %v3273_v15  ;;  %2632 = vmatprep.subr.bf16.mxu0 %v3275_v16 }
 0x57f   :  { %2602 = vmatpush1.bf16.msra.mxu1 %v3279_v24  ;;  %2634 = vmatpush1.bf16.msra.mxu0 %v3281_v25 }
 0x580   :  { %2604 = vmatprep.subr.bf16.mxu1 %v3289_v33  ;;  %2636 = vmatprep.subr.bf16.mxu0 %v3291_v34 }
 0x583   :  { %2606 = vmatpush1.bf16.msra.mxu1 %v3296_v42  ;;  %2638 = vmatpush1.bf16.msra.mxu0 %v3298_v43 }
 0x584   :  { %2608 = vmatprep.subr.bf16.mxu1 %v3304_v51  ;;  %2640 = vmatprep.subr.bf16.mxu0 %v3306_v54 }
 0x587   :  { %2610 = vmatpush1.bf16.msra.mxu1 %v3310_v63  ;;  %2642 = vmatpush1.bf16.msra.mxu0 %v3312_v0 }
 0x588   :  { %2612 = vmatprep.subr.bf16.mxu1 %v3320_v12  ;;  %2644 = vmatprep.subr.bf16.mxu0 %v3322_v13 }
 0x58b   :  { %2614 = vmatpush1.bf16.msra.mxu1 %v3326_v7  ;;  %2646 = vmatpush1.bf16.msra.mxu0 %v3328_v59 }
 0x58c   :  { %2648 = vmatprep.subr.bf16.mxu1 %v3205_v3  ;;  %2680 = vmatprep.subr.bf16.mxu0 %v3208_v6 }
 0x641   :  { %v1407_v17 = vpop.f32.mrb[8].mxu1  ;;  %v1478_v18 = vpop.f32.mrb[16].mxu0 }
 0x642   :  { %v2783_v21 = vadd.f32 %v1407_v17, %v3379_v26  ;;  %v1409_v31 = vpop.f32.mrb[9].mxu1  ;;  %v1480_v32 = vpop.f32.mrb[17].mxu0  ;;  %v2799_v46 = vadd.f32 %v1478_v18, %v3388_v50 }
 0x643   :  { %v2784_v35 = vadd.f32 %v1409_v31, %v3381_v27  ;;  %v2800_v40 = vadd.f32 %v1480_v32, %v3385_v47 }
 0x644   :  { %v2085_v38 = vmul.f32 -1.442695, %v2783_v21 }
 0x645   :  { %v2086_v39 = vmul.f32 -1.442695, %v2784_v35  ;;  %v2087_v41 = vmul.f32 -1.442695, %v2800_v40 }
 0x646   :  { %2913 = vpow2.f32 %v2085_v38 }
 0x647   :  { %2915 = vpow2.f32 %v2086_v39 }
 0x648   :  { %2917 = vpow2.f32 %v2087_v41 }
 0x649   :  { %2919 = vtanh.f32 %v2799_v46 }
 0x650   :  { %v2914_v48 = vpop.eup %2913 }
 0x651   :  { %v2916_v49 = vpop.eup %2915  ;;  %v1490_v55 = vadd.f32 1.0, %v2914_v48 }
 0x652   :  { %v1496_v56 = vadd.f32 1.0, %v2916_v49  ;;  %v2918_v57 = vpop.eup %2917 }
 0x653   :  { %2921 = vrcp.f32 %v1490_v55  ;;  %v2920_v58 = vpop.eup %2919  ;;  %v1503_v4 = vadd.f32 1.0, %v2918_v57 }
 0x654   :  { %2923 = vrcp.f32 %v1496_v56 }
 0x655   :  { %2925 = vrcp.f32 %v1503_v4 }
 0x65d   :  { %v2922_v62 = vpop.eup %2921 }
 0x65e   :  { %v2924_v1 = vpop.eup %2923  ;;  %v1507_v2 = vmul.f32 %v2922_v62, %v2920_v58 }
 0x65f   :  { %v1506_v10 = vmul.f32 %v2924_v1, %v3517_v14  ;;  %v2926_v22 = vpop.eup %2925 }
 0x661   :  { %v3559_v11 = vadd.f32 %v1507_v2, %v1506_v10 }
 0x663   :  { %2927 = vtanh.f32 %v3559_v11 }
 0x66d   :  { %v2928_v23 = vpop.eup %2927 }
 0x66e   :  { %v1510_v28 = vmul.f32 %v2928_v23, %v2926_v22 }
 0x670   :  { %1581 = vmatmul.mubr.f32.vlgmr.msra.gmra.mrb[10].mxu1 %v1510_v28  ;;  %1652 = vmatmul.mubr.f32.vlgmr.msra.gmra.mrb[18].mxu0 %v1510_v28 }
 0x671   :  { %2650 = vmatpush1.bf16.msra.mxu1 %v3219_v19  ;;  %2682 = vmatpush1.bf16.msra.mxu0 %v3221_v20 }
 0x672   :  { %2652 = vmatprep.subr.bf16.mxu1 %v3224_v29  ;;  %2684 = vmatprep.subr.bf16.mxu0 %v3226_v30 }
 0x673   :  { %1755 = vmatprep.mubr.f32.mxu1 %v3103_v5  ;;  %1826 = vmatprep.mubr.f32.mxu0 %v3103_v5 }
 0x675   :  { %2654 = vmatpush1.bf16.msra.mxu1 %v3231_v36  ;;  %2686 = vmatpush1.bf16.msra.mxu0 %v3233_v37 }
 0x676   :  { %2656 = vmatprep.subr.bf16.mxu1 %v3241_v44  ;;  %2688 = vmatprep.subr.bf16.mxu0 %v3243_v45 }
 0x679   :  { %2658 = vmatpush1.bf16.msra.mxu1 %v3247_v52  ;;  %2690 = vmatpush1.bf16.msra.mxu0 %v3249_v53 }
 0x67a   :  { %2660 = vmatprep.subr.bf16.mxu1 %v3258_v60  ;;  %2692 = vmatprep.subr.bf16.mxu0 %v3260_v61 }
 0x67d   :  { %2662 = vmatpush1.bf16.msra.mxu1 %v3265_v8  ;;  %2694 = vmatpush1.bf16.msra.mxu0 %v3267_v9 }
 0x67e   :  { %2664 = vmatprep.subr.bf16.mxu1 %v3273_v15  ;;  %2696 = vmatprep.subr.bf16.mxu0 %v3275_v16 }
 0x681   :  { %2666 = vmatpush1.bf16.msra.mxu1 %v3279_v24  ;;  %2698 = vmatpush1.bf16.msra.mxu0 %v3281_v25 }
 0x682   :  { %2668 = vmatprep.subr.bf16.mxu1 %v3289_v33  ;;  %2700 = vmatprep.subr.bf16.mxu0 %v3291_v34 }
 0x685   :  { %2670 = vmatpush1.bf16.msra.mxu1 %v3296_v42  ;;  %2702 = vmatpush1.bf16.msra.mxu0 %v3298_v43 }
 0x686   :  { %2672 = vmatprep.subr.bf16.mxu1 %v3304_v51  ;;  %2704 = vmatprep.subr.bf16.mxu0 %v3306_v54 }
 0x689   :  { %2674 = vmatpush1.bf16.msra.mxu1 %v3310_v63  ;;  %2706 = vmatpush1.bf16.msra.mxu0 %v3312_v0 }
 0x68a   :  { %2676 = vmatprep.subr.bf16.mxu1 %v3320_v12  ;;  %2708 = vmatprep.subr.bf16.mxu0 %v3322_v13 }
 0x68d   :  { %2678 = vmatpush1.bf16.msra.mxu1 %v3326_v7  ;;  %2710 = vmatpush1.bf16.msra.mxu0 %v3328_v59 }
 0x68e   :  { %2712 = vmatprep.subr.bf16.mxu1 %v3205_v3  ;;  %2744 = vmatprep.subr.bf16.mxu0 %v3208_v6 }
 0x743   :  { %v1582_v14 = vpop.f32.mrb[10].mxu1  ;;  %v1653_v17 = vpop.f32.mrb[18].mxu0 }
 0x744   :  { %v2785_v18 = vadd.f32 %v1582_v14, %v3379_v26  ;;  %v1584_v21 = vpop.f32.mrb[11].mxu1  ;;  %v1655_v31 = vpop.f32.mrb[19].mxu0  ;;  %v2801_v41 = vadd.f32 %v1653_v17, %v3388_v50 }
 0x745   :  { %v2786_v32 = vadd.f32 %v1584_v21, %v3381_v27  ;;  %v2802_v39 = vadd.f32 %v1655_v31, %v3385_v47 }
 0x746   :  { %v2088_v35 = vmul.f32 -1.442695, %v2785_v18 }
 0x747   :  { %v2089_v38 = vmul.f32 -1.442695, %v2786_v32  ;;  %v2090_v40 = vmul.f32 -1.442695, %v2802_v39 }
 0x748   :  { %2929 = vpow2.f32 %v2088_v35 }
 0x749   :  { %2931 = vpow2.f32 %v2089_v38 }
 0x74a   :  { %2933 = vpow2.f32 %v2090_v40 }
 0x74b   :  { %2935 = vtanh.f32 %v2801_v41 }
 0x752   :  { %v2930_v3 = vpop.eup %2929 }
 0x753   :  { %v2932_v46 = vpop.eup %2931  ;;  %v1665_v6 = vadd.f32 1.0, %v2930_v3 }
 0x754   :  { %v1671_v48 = vadd.f32 1.0, %v2932_v46  ;;  %v2934_v49 = vpop.eup %2933 }
 0x755   :  { %2937 = vrcp.f32 %v1665_v6  ;;  %v2936_v55 = vpop.eup %2935  ;;  %v1678_v62 = vadd.f32 1.0, %v2934_v49  ;;  %v2097_v6 = vld [vmem:[%s3669_s6] ss:$0 sm:$0xff] }
 0x756   :  { %2939 = vrcp.f32 %v1671_v48 }
 0x757   :  { %2941 = vrcp.f32 %v1678_v62 }
 0x75f   :  { %v2938_v56 = vpop.eup %2937 }
 0x760   :  { %v2940_v57 = vpop.eup %2939  ;;  %v1682_v58 = vmul.f32 %v2938_v56, %v2936_v55  ;;  %v2098_v55 = vld [vmem:[%s3670_s7] ss:$0 sm:$0xff] }
 0x761   :  { %v1681_v1 = vmul.f32 %v2940_v57, %v3559_v11  ;;  %v2942_v4 = vpop.eup %2941 }
 0x763   :  { %v3601_v2 = vadd.f32 %v1682_v58, %v1681_v1 }
 0x765   :  { %2943 = vtanh.f32 %v3601_v2 }
 0x76f   :  { %v2944_v10 = vpop.eup %2943 }
 0x770   :  { %v1685_v22 = vmul.f32 %v2944_v10, %v2942_v4 }
 0x772   :  { %1756 = vmatmul.mubr.f32.vlgmr.msra.gmra.mrb[12].mxu1 %v1685_v22  ;;  %1827 = vmatmul.mubr.f32.vlgmr.msra.gmra.mrb[20].mxu0 %v1685_v22 }
 0x773   :  { %2714 = vmatpush1.bf16.msra.mxu1 %v3219_v19  ;;  %2746 = vmatpush1.bf16.msra.mxu0 %v3221_v20 }
 0x774   :  { %2716 = vmatprep.subr.bf16.mxu1 %v3224_v29  ;;  %2748 = vmatprep.subr.bf16.mxu0 %v3226_v30 }
 0x775   :  { %1930 = vmatprep.mubr.f32.mxu1 %v3103_v5  ;;  %2001 = vmatprep.mubr.f32.mxu0 %v3103_v5 }
 0x777   :  { %2718 = vmatpush1.bf16.msra.mxu1 %v3231_v36  ;;  %2750 = vmatpush1.bf16.msra.mxu0 %v3233_v37 }
 0x778   :  { %2720 = vmatprep.subr.bf16.mxu1 %v3241_v44  ;;  %2752 = vmatprep.subr.bf16.mxu0 %v3243_v45 }
 0x77b   :  { %2722 = vmatpush1.bf16.msra.mxu1 %v3247_v52  ;;  %2754 = vmatpush1.bf16.msra.mxu0 %v3249_v53 }
 0x77c   :  { %2724 = vmatprep.subr.bf16.mxu1 %v3258_v60  ;;  %2756 = vmatprep.subr.bf16.mxu0 %v3260_v61 }
 0x77f   :  { %2726 = vmatpush1.bf16.msra.mxu1 %v3265_v8  ;;  %2758 = vmatpush1.bf16.msra.mxu0 %v3267_v9 }
 0x780   :  { %2728 = vmatprep.subr.bf16.mxu1 %v3273_v15  ;;  %2760 = vmatprep.subr.bf16.mxu0 %v3275_v16 }
 0x783   :  { %2730 = vmatpush1.bf16.msra.mxu1 %v3279_v24  ;;  %2762 = vmatpush1.bf16.msra.mxu0 %v3281_v25 }
 0x784   :  { %2732 = vmatprep.subr.bf16.mxu1 %v3289_v33  ;;  %2764 = vmatprep.subr.bf16.mxu0 %v3291_v34 }
 0x787   :  { %2734 = vmatpush1.bf16.msra.mxu1 %v3296_v42  ;;  %2766 = vmatpush1.bf16.msra.mxu0 %v3298_v43 }
 0x788   :  { %2736 = vmatprep.subr.bf16.mxu1 %v3304_v51  ;;  %2768 = vmatprep.subr.bf16.mxu0 %v3306_v54 }
 0x78b   :  { %2738 = vmatpush1.bf16.msra.mxu1 %v3310_v63  ;;  %2770 = vmatpush1.bf16.msra.mxu0 %v3312_v0 }
 0x78c   :  { %2740 = vmatprep.subr.bf16.mxu1 %v3320_v12  ;;  %2772 = vmatprep.subr.bf16.mxu0 %v3322_v13 }
 0x78f   :  { %2742 = vmatpush1.bf16.msra.mxu1 %v3326_v7  ;;  %2774 = vmatpush1.bf16.msra.mxu0 %v3328_v59 }
 0x845   :  { %v1757_v5 = vpop.f32.mrb[12].mxu1  ;;  %v1828_v19 = vpop.f32.mrb[20].mxu0 }
 0x846   :  { %v2787_v20 = vadd.f32 %v1757_v5, %v3379_v26  ;;  %v1759_v29 = vpop.f32.mrb[13].mxu1  ;;  %v1830_v30 = vpop.f32.mrb[21].mxu0  ;;  %v2803_v53 = vadd.f32 %v1828_v19, %v3388_v50 }
 0x847   :  { %v2788_v36 = vadd.f32 %v1759_v29, %v3381_v27  ;;  %v2804_v45 = vadd.f32 %v1830_v30, %v3385_v47 }
 0x848   :  { %v2091_v37 = vmul.f32 -1.442695, %v2787_v20 }
 0x849   :  { %v2092_v44 = vmul.f32 -1.442695, %v2788_v36  ;;  %v2093_v52 = vmul.f32 -1.442695, %v2804_v45 }
 0x84a   :  { %2945 = vpow2.f32 %v2091_v37 }
 0x84b   :  { %2947 = vpow2.f32 %v2092_v44 }
 0x84c   :  { %2949 = vpow2.f32 %v2093_v52 }
 0x84d   :  { %2951 = vtanh.f32 %v2803_v53 }
 0x854   :  { %v2946_v60 = vpop.eup %2945 }
 0x855   :  { %v2948_v61 = vpop.eup %2947  ;;  %v1840_v8 = vadd.f32 1.0, %v2946_v60 }
 0x856   :  { %v1846_v9 = vadd.f32 1.0, %v2948_v61  ;;  %v2950_v15 = vpop.eup %2949 }
 0x857   :  { %2953 = vrcp.f32 %v1840_v8  ;;  %v2952_v16 = vpop.eup %2951  ;;  %v1853_v34 = vadd.f32 1.0, %v2950_v15 }
 0x858   :  { %2955 = vrcp.f32 %v1846_v9 }
 0x859   :  { %2957 = vrcp.f32 %v1853_v34 }
 0x861   :  { %v2954_v24 = vpop.eup %2953 }
 0x862   :  { %v2956_v25 = vpop.eup %2955  ;;  %v1857_v33 = vmul.f32 %v2954_v24, %v2952_v16 }
 0x863   :  { %v1856_v42 = vmul.f32 %v2956_v25, %v3601_v2  ;;  %v2958_v51 = vpop.eup %2957 }
 0x865   :  { %v1858_v43 = vadd.f32 %v1857_v33, %v1856_v42 }
 0x867   :  { %2959 = vtanh.f32 %v1858_v43 }
 0x871   :  { %v2960_v54 = vpop.eup %2959 }
 0x872   :  { %v1860_v63 = vmul.f32 %v2960_v54, %v2958_v51 }
 0x874   :  { %1931 = vmatmul.mubr.f32.vlgmr.msra.gmra.mrb[14].mxu1 %v1860_v63  ;;  %2002 = vmatmul.mubr.f32.vlgmr.msra.gmra.mrb[22].mxu0 %v1860_v63 }
 0x947   :  { %v1932_v0 = vpop.f32.mrb[14].mxu1  ;;  %v2003_v12 = vpop.f32.mrb[22].mxu0 }
 0x948   :  { %v2789_v13 = vadd.f32 %v1932_v0, %v3379_v26  ;;  %v1934_v7 = vpop.f32.mrb[15].mxu1  ;;  %v2005_v59 = vpop.f32.mrb[23].mxu0  ;;  %v2805_v18 = vadd.f32 %v2003_v12, %v3388_v50 }
 0x949   :  { %v2790_v11 = vadd.f32 %v1934_v7, %v3381_v27  ;;  %v2806_v14 = vadd.f32 %v2005_v59, %v3385_v47 }
 0x94a   :  { %v2094_v23 = vmul.f32 -1.442695, %v2789_v13 }
 0x94b   :  { %v2095_v28 = vmul.f32 -1.442695, %v2790_v11  ;;  %v2096_v17 = vmul.f32 -1.442695, %v2806_v14 }
 0x94c   :  { %2961 = vpow2.f32 %v2094_v23 }
 0x94d   :  { %2963 = vpow2.f32 %v2095_v28 }
 0x94e   :  { %2965 = vpow2.f32 %v2096_v17 }
 0x94f   :  { %2967 = vtanh.f32 %v2805_v18 }
 0x956   :  { %v2962_v21 = vpop.eup %2961 }
 0x957   :  { %v2964_v31 = vpop.eup %2963  ;;  %v2015_v32 = vadd.f32 1.0, %v2962_v21 }
 0x958   :  { %v2021_v35 = vadd.f32 1.0, %v2964_v31  ;;  %v2966_v26 = vpop.eup %2965 }
 0x959   :  { %2969 = vrcp.f32 %v2015_v32  ;;  %v2968_v38 = vpop.eup %2967  ;;  %v2028_v41 = vadd.f32 1.0, %v2966_v26 }
 0x95a   :  { %2971 = vrcp.f32 %v2021_v35 }
 0x95b   :  { %2973 = vrcp.f32 %v2028_v41 }
 0x963   :  { %v2970_v27 = vpop.eup %2969 }
 0x964   :  { %v2972_v39 = vpop.eup %2971  ;;  %v2032_v40 = vmul.f32 %v2970_v27, %v2968_v38 }
 0x965   :  { %v2031_v3 = vmul.f32 %v2972_v39, %v1858_v43  ;;  %v2974_v47 = vpop.eup %2973 }
 0x967   :  { %v2033_v46 = vadd.f32 %v2032_v40, %v2031_v3 }
 0x969   :  { %2975 = vtanh.f32 %v2033_v46 }
 0x973   :  { %v2976_v50 = vpop.eup %2975 }
 0x974   :  { %v2035_v48 = vmul.f32 %v2976_v50, %v2974_v47 }
 0x976   :  { %v2043_v49 = vmul.f32 %v2097_v6, %v2035_v48 }
 0x978   :  { %2044 = vadd.xlane.f32.xlu0 %v2043_v49 }
 0xa05   :  { %v2045_v56 = vpop.xlane.xlu0 %2044 }
 0xa06   :  { %v2053_v57 = vadd.f32 %v2098_v55, %v2045_v56 }
 0xa08   :  { %2054 = vst [vmem:[#allocation11] sm:$0xff] %v2053_v57 }
 0xa09   :  { %3076 = shalt.err (!%p3073_p8)
}
 0xa0a   :  { %s3077_s0 = scalar_lea.hbm %s3671_s8, 128 }
 0xa0b   :  { %p3078_p9 = scmp.ne.s32.totalorder %s3671_s8, %s3077_s0  ;;  %p3081_p10 = scmp.lt.u32.totalorder %s3077_s0, %s3671_s8 }
 0xa0d   :  { %p3083_p11 = pnand %p3081_p10, %p3078_p9 }
 0xa0f   :  { %3086 = shalt.err (!%p3083_p11)
}
 0xa10   :  { %2064 = dma.vmem_to_hbm [thread:$0]  %s2062_s16, 128, %s3671_s8, [#allocation5]  }
 0xa11   :  { %3093 = dma.done.wait [#allocation5], 128  }
 0xa12   :  { %3094 = vsyncadd [#allocation5], 4294967168 }
 0xa13   :  { %2068 = vsyncpa [#allocation4], 1 }
 0xa14   :  { %2069 = vsyncpa [#allocation7], 1 }
 0xa15   :  { %2070 = vsyncpa [#allocation10], 1 }
 0xa16   :  { %2071 = vsyncpa [#allocation5], 1 }

</bundles_post_ra>
